<compile_context>
chip_gen: v5e
topology: v5e:2x2
jax: 0.10.0
libtpu: 0.0.40
codegen_flags: <defaults>
</compile_context>

<pallas_src>
import functools
import math

import jax
import jax.numpy as jnp
from jax.experimental import pallas as pl
from jax.experimental.pallas import tpu as pltpu

F32 = jnp.float32
BF16 = jnp.bfloat16


def _round_up(x, m):
    return ((x + m - 1) // m) * m


def _m_tiles(M, cap=256):
    if M <= cap:
        tm = _round_up(M, 8)
        return tm, tm
    return cap, _round_up(M, cap)


# ---------------------------------------------------------------------------
# Tiled matmul with fused bias / activation / residual epilogue
# ---------------------------------------------------------------------------

def _matmul_kernel(x_ref, w_ref, b_ref, *rest, activation, has_residual):
    if has_residual:
        r_ref, o_ref = rest
    else:
        (o_ref,) = rest

    k = pl.program_id(2)

    @pl.when(k == 0)
    def _():
        o_ref[...] = jnp.zeros_like(o_ref)

    o_ref[...] += jnp.dot(x_ref[...], w_ref[...],
                          preferred_element_type=jnp.float32)

    @pl.when(k == pl.num_programs(2) - 1)
    def _():
        y = o_ref[...] + b_ref[...]
        if activation == "relu":
            y = jnp.maximum(y, 0.0)
        elif activation == "silu":
            y = y * jax.nn.sigmoid(y)
        if has_residual:
            y = y + r_ref[...]
        o_ref[...] = y


def pl_linear(x, w, b, activation=None, residual=None):
    """y = act(x @ w + b) [+ residual].  x:(M,K) w:(K,N) b:(N,)."""
    M, K = x.shape
    N = w.shape[1]

    tm, Mp = _m_tiles(M, cap=256)
    if N <= 512:
        tn, Np = N, N
    else:
        tn, Np = 256, _round_up(N, 256)
    if K <= 1024:
        tk, Kp = K, K
    else:
        tk, Kp = 512, _round_up(K, 512)

    xb = x.astype(BF16)
    wb = w.astype(BF16)
    if (Mp, Kp) != (M, K):
        xb = jnp.pad(xb, ((0, Mp - M), (0, Kp - K)))
    if (Kp, Np) != (K, N):
        wb = jnp.pad(wb, ((0, Kp - K), (0, Np - N)))
    bb = b.astype(F32).reshape(1, N)
    if Np != N:
        bb = jnp.pad(bb, ((0, 0), (0, Np - N)))

    inputs = [xb, wb, bb]
    in_specs = [
        pl.BlockSpec((tm, tk), lambda i, j, k: (i, k)),
        pl.BlockSpec((tk, tn), lambda i, j, k: (k, j)),
        pl.BlockSpec((1, tn), lambda i, j, k: (0, j)),
    ]
    has_res = residual is not None
    if has_res:
        rb = residual.astype(F32)
        if (Mp, Np) != (M, N):
            rb = jnp.pad(rb, ((0, Mp - M), (0, Np - N)))
        inputs.append(rb)
        in_specs.append(pl.BlockSpec((tm, tn), lambda i, j, k: (i, j)))

    out = pl.pallas_call(
        functools.partial(_matmul_kernel, activation=activation,
                          has_residual=has_res),
        out_shape=jax.ShapeDtypeStruct((Mp, Np), F32),
        grid=(Mp // tm, Np // tn, Kp // tk),
        in_specs=in_specs,
        out_specs=pl.BlockSpec((tm, tn), lambda i, j, k: (i, j)),
        compiler_params=pltpu.CompilerParams(
            dimension_semantics=("parallel", "parallel", "arbitrary")),
    )(*inputs)
    if (Mp, Np) != (M, N):
        out = out[:M, :N]
    return out


# ---------------------------------------------------------------------------
# Fused LayerNorm -> Linear (-> GLU / SiLU)
# ---------------------------------------------------------------------------

def _ln_matmul_kernel(x_ref, g_ref, be_ref, w_ref, b_ref, o_ref, *, eps,
                      activation):
    x = x_ref[...].astype(jnp.float32)
    mean = jnp.mean(x, axis=-1, keepdims=True)
    var = jnp.mean(jnp.square(x - mean), axis=-1, keepdims=True)
    h = (x - mean) * jax.lax.rsqrt(var + eps) * g_ref[...] + be_ref[...]
    y = jnp.dot(h.astype(w_ref.dtype), w_ref[...],
                preferred_element_type=jnp.float32) + b_ref[...]
    if activation == "glu":
        half = y.shape[-1] // 2
        y = y[:, :half] * jax.nn.sigmoid(y[:, half:])
    elif activation == "silu":
        y = y * jax.nn.sigmoid(y)
    o_ref[...] = y.astype(o_ref.dtype)


def pl_ln_linear(x2d, ln_p, w, b, activation=None, eps=1e-5):
    M, K = x2d.shape
    N = w.shape[1]
    Nout = N // 2 if activation == "glu" else N
    tm, Mp = _m_tiles(M)
    xp = x2d if Mp == M else jnp.pad(x2d, ((0, Mp - M), (0, 0)))
    out = pl.pallas_call(
        functools.partial(_ln_matmul_kernel, eps=eps, activation=activation),
        out_shape=jax.ShapeDtypeStruct((Mp, Nout), F32),
        grid=(Mp // tm,),
        in_specs=[
            pl.BlockSpec((tm, K), lambda i: (i, 0)),
            pl.BlockSpec((1, K), lambda i: (0, 0)),
            pl.BlockSpec((1, K), lambda i: (0, 0)),
            pl.BlockSpec((K, N), lambda i: (0, 0)),
            pl.BlockSpec((1, N), lambda i: (0, 0)),
        ],
        out_specs=pl.BlockSpec((tm, Nout), lambda i: (i, 0)),
        compiler_params=pltpu.CompilerParams(
            dimension_semantics=("parallel",)),
    )(xp, ln_p["g"].reshape(1, K), ln_p["b"].reshape(1, K),
      w.astype(BF16), b.astype(F32).reshape(1, N))
    return out[:M]


# ---------------------------------------------------------------------------
# Fully fused Conformer FFN block: x + 0.5 * (Lin2(SiLU(Lin1(LN(x)))))
# ---------------------------------------------------------------------------

def _ffn_kernel(x_ref, g_ref, be_ref, w1_ref, b1_ref, w2_ref, b2_ref, o_ref,
                *, eps):
    x = x_ref[...].astype(jnp.float32)
    mean = jnp.mean(x, axis=-1, keepdims=True)
    var = jnp.mean(jnp.square(x - mean), axis=-1, keepdims=True)
    h = (x - mean) * jax.lax.rsqrt(var + eps) * g_ref[...] + be_ref[...]
    h = jnp.dot(h.astype(w1_ref.dtype), w1_ref[...],
                preferred_element_type=jnp.float32) + b1_ref[...]
    h = h * jax.nn.sigmoid(h)                              # SiLU
    h = jnp.dot(h.astype(w2_ref.dtype), w2_ref[...],
                preferred_element_type=jnp.float32) + b2_ref[...]
    o_ref[...] = (x + 0.5 * h).astype(o_ref.dtype)


def pl_ffn(x2d, p, eps=1e-5):
    M, E = x2d.shape
    Fdim = p["w1"].shape[1]
    tm, Mp = _m_tiles(M)
    xp = x2d if Mp == M else jnp.pad(x2d, ((0, Mp - M), (0, 0)))
    out = pl.pallas_call(
        functools.partial(_ffn_kernel, eps=eps),
        out_shape=jax.ShapeDtypeStruct((Mp, E), F32),
        grid=(Mp // tm,),
        in_specs=[
            pl.BlockSpec((tm, E), lambda i: (i, 0)),
            pl.BlockSpec((1, E), lambda i: (0, 0)),
            pl.BlockSpec((1, E), lambda i: (0, 0)),
            pl.BlockSpec((E, Fdim), lambda i: (0, 0)),
            pl.BlockSpec((1, Fdim), lambda i: (0, 0)),
            pl.BlockSpec((Fdim, E), lambda i: (0, 0)),
            pl.BlockSpec((1, E), lambda i: (0, 0)),
        ],
        out_specs=pl.BlockSpec((tm, E), lambda i: (i, 0)),
        compiler_params=pltpu.CompilerParams(
            dimension_semantics=("parallel",)),
    )(xp, p["ln"]["g"].reshape(1, E), p["ln"]["b"].reshape(1, E),
      p["w1"].astype(BF16), p["b1"].astype(F32).reshape(1, Fdim),
      p["w2"].astype(BF16), p["b2"].astype(F32).reshape(1, E))
    return out[:M]


# ---------------------------------------------------------------------------
# LayerNorm (tiled over rows)
# ---------------------------------------------------------------------------

def _layernorm_kernel(x_ref, g_ref, b_ref, o_ref, *, eps):
    x = x_ref[...].astype(jnp.float32)
    mean = jnp.mean(x, axis=-1, keepdims=True)
    var = jnp.mean(jnp.square(x - mean), axis=-1, keepdims=True)
    o_ref[...] = ((x - mean) * jax.lax.rsqrt(var + eps) * g_ref[...]
                  + b_ref[...]).astype(o_ref.dtype)


def pl_layernorm(x2d, p, eps=1e-5):
    M, D = x2d.shape
    tm, Mp = _m_tiles(M, cap=512)
    xp = x2d if Mp == M else jnp.pad(x2d, ((0, Mp - M), (0, 0)))
    out = pl.pallas_call(
        functools.partial(_layernorm_kernel, eps=eps),
        out_shape=jax.ShapeDtypeStruct((Mp, D), F32),
        grid=(Mp // tm,),
        in_specs=[
            pl.BlockSpec((tm, D), lambda i: (i, 0)),
            pl.BlockSpec((1, D), lambda i: (0, 0)),
            pl.BlockSpec((1, D), lambda i: (0, 0)),
        ],
        out_specs=pl.BlockSpec((tm, D), lambda i: (i, 0)),
        compiler_params=pltpu.CompilerParams(
            dimension_semantics=("parallel",)),
    )(xp, p["g"].reshape(1, D), p["b"].reshape(1, D))
    return out[:M]


# ---------------------------------------------------------------------------
# Multi-head self-attention (all heads of one batch element per grid step)
# ---------------------------------------------------------------------------

def _attn_kernel(q_ref, k_ref, v_ref, o_ref, *, num_heads, scale):
    q = q_ref[...].astype(jnp.float32)   # (Lq, E)
    k = k_ref[...].astype(jnp.float32)   # (Lk, E)
    v = v_ref[...].astype(jnp.float32)   # (Lk, E)
    E = q.shape[-1]
    dh = E // num_heads
    outs = []
    for h in range(num_heads):
        sl = slice(h * dh, (h + 1) * dh)
        s = jax.lax.dot_general(q[:, sl], k[:, sl], (((1,), (1,)), ((), ())),
                                preferred_element_type=jnp.float32) * scale
        s = s - jnp.max(s, axis=-1, keepdims=True)
        p = jnp.exp(s)
        p = p * pl.reciprocal(jnp.sum(p, axis=-1, keepdims=True), approx=True)
        outs.append(jnp.dot(p, v[:, sl], preferred_element_type=jnp.float32))
    o_ref[...] = jnp.concatenate(outs, axis=-1).astype(o_ref.dtype)


def pl_attention(q, k, v, num_heads, scale):
    """q/k/v: (B, L, E) -> (B, L, E); lane-dense per-batch blocks."""
    B, Lq, E = q.shape
    Lk = k.shape[1]
    return pl.pallas_call(
        functools.partial(_attn_kernel, num_heads=num_heads, scale=scale),
        out_shape=jax.ShapeDtypeStruct((B, Lq, E), F32),
        grid=(B,),
        in_specs=[
            pl.BlockSpec((None, Lq, E), lambda b: (b, 0, 0)),
            pl.BlockSpec((None, Lk, E), lambda b: (b, 0, 0)),
            pl.BlockSpec((None, Lk, E), lambda b: (b, 0, 0)),
        ],
        out_specs=pl.BlockSpec((None, Lq, E), lambda b: (b, 0, 0)),
        compiler_params=pltpu.CompilerParams(
            dimension_semantics=("parallel",)),
    )(q.astype(F32), k.astype(F32), v.astype(F32))


# ---------------------------------------------------------------------------
# Depthwise Conv1d + folded BatchNorm (eval) + SiLU, whole tensor in one block
# ---------------------------------------------------------------------------

def _dwconv_kernel(xp_ref, w_ref, b_ref, o_ref, *, K, T):
    x = xp_ref[...].astype(jnp.float32)      # (B, T + K - 1, D)
    w = w_ref[...].astype(jnp.float32)       # (K, D)
    acc = x[:, 0:T, :] * w[0:1]
    for k in range(1, K):
        acc = acc + x[:, k:k + T, :] * w[k:k + 1]
    y = acc + b_ref[...]
    y = y * jax.nn.sigmoid(y)                # SiLU
    o_ref[...] = y.astype(o_ref.dtype)


def pl_depthwise_conv1d(x, w, b):
    """x:(B,T,D), w:(K,D), b:(D,) -> (B,T,D). Same-padding depthwise conv."""
    B, T, D = x.shape
    K = w.shape[0]
    pad = (K - 1) // 2
    xp = jnp.pad(x, ((0, 0), (pad, pad), (0, 0)))
    Tp = T + 2 * pad
    return pl.pallas_call(
        functools.partial(_dwconv_kernel, K=K, T=T),
        out_shape=jax.ShapeDtypeStruct((B, T, D), F32),
        grid=(1,),
        in_specs=[
            pl.BlockSpec((B, Tp, D), lambda i: (0, 0, 0)),
            pl.BlockSpec((K, D), lambda i: (0, 0)),
            pl.BlockSpec((1, D), lambda i: (0, 0)),
        ],
        out_specs=pl.BlockSpec((B, T, D), lambda i: (0, 0, 0)),
    )(xp.astype(F32), w.astype(F32), b.astype(F32).reshape(1, D))


# ---------------------------------------------------------------------------
# Parameter initialization (deterministic, synthetic)
# ---------------------------------------------------------------------------

class Init:
    def __init__(self, key):
        self.key = key

    def normal(self, shape, scale=0.05):
        self.key, sub = jax.random.split(self.key)
        return (scale * jax.random.normal(sub, shape)).astype(F32)

    def zeros(self, shape):
        return jnp.zeros(shape, F32)


def ln_init(d):
    return {"g": jnp.ones((d,), F32), "b": jnp.zeros((d,), F32)}


def conformer_layer_init(init, e, k, eps=1e-5):
    def ffn():
        return {"ln": ln_init(e),
                "w1": init.normal((e, e)), "b1": init.zeros((e,)),
                "w2": init.normal((e, e)), "b2": init.zeros((e,))}
    # depthwise conv weight with BatchNorm1d (eval running stats) folded in
    gamma = 1.0 + init.normal((e,), 0.02)
    beta = init.normal((e,), 0.02)
    scale = gamma / jnp.sqrt(1.0 + eps)       # running_mean=0, running_var=1
    dw_w = init.normal((k, e)) * scale[None, :]
    return {"ffn1": ffn(), "ffn2": ffn(),
            "attn_ln": ln_init(e),
            "attn": {"w_qkv": init.normal((e, 3 * e)),
                     "b_qkv": init.zeros((3 * e,)),
                     "w_o": init.normal((e, e)), "b_o": init.zeros((e,))},
            "conv_ln": ln_init(e),
            "pw1_w": init.normal((e, 2 * e)), "pw1_b": init.zeros((2 * e,)),
            "dw_w": dw_w, "dw_b": beta,
            "pw2_w": init.normal((e, e)), "pw2_b": init.zeros((e,)),
            "final_ln": ln_init(e)}


def build_params(key, cfg):
    init = Init(key)
    E = cfg["encoder_dim"]
    return {
        "proj_w": init.normal((cfg["input_dim"], E)),
        "proj_b": init.zeros((E,)),
        "layers": [conformer_layer_init(init, E,
                                        cfg["depthwise_conv_kernel_size"])
                   for _ in range(cfg["num_layers"])],
    }


# ---------------------------------------------------------------------------
# Forward (glue orchestrating the Pallas kernels)
# ---------------------------------------------------------------------------

def conformer_layer(x, p, num_heads):
    B, T, E = x.shape
    dh = E // num_heads

    # FFN1 (half-step) — fully fused LN + Linear + SiLU + Linear + residual
    x = pl_ffn(x.reshape(B * T, E), p["ffn1"]).reshape(B, T, E)

    # Self-attention block: fused LN + QKV projection, per-batch MHA kernel,
    # output projection with residual fused in the epilogue.
    qkv = pl_ln_linear(x.reshape(B * T, E), p["attn_ln"],
                       p["attn"]["w_qkv"], p["attn"]["b_qkv"])
    qkv = qkv.reshape(B, T, 3 * E)
    q, k, v = qkv[..., :E], qkv[..., E:2 * E], qkv[..., 2 * E:]
    o = pl_attention(q, k, v, num_heads, scale=1.0 / math.sqrt(dh))
    x = pl_linear(o.reshape(B * T, E), p["attn"]["w_o"], p["attn"]["b_o"],
                  residual=x.reshape(B * T, E)).reshape(B, T, E)

    # Convolution module: fused LN + pointwise-conv1 + GLU, depthwise conv
    # (+folded BN + SiLU), pointwise-conv2 with fused residual.
    h = pl_ln_linear(x.reshape(B * T, E), p["conv_ln"],
                     p["pw1_w"], p["pw1_b"], activation="glu")
    h = h.reshape(B, T, E)
    h = pl_depthwise_conv1d(h, p["dw_w"], p["dw_b"])
    x = pl_linear(h.reshape(B * T, E), p["pw2_w"], p["pw2_b"],
                  residual=x.reshape(B * T, E)).reshape(B, T, E)

    # FFN2 (half-step) + final LayerNorm
    x = pl_ffn(x.reshape(B * T, E), p["ffn2"]).reshape(B, T, E)
    x = pl_layernorm(x.reshape(B * T, E), p["final_ln"]).reshape(B, T, E)
    return x


def speech_encoder(x, params, cfg):
    B, T, Din = x.shape
    E = cfg["encoder_dim"]
    # input projection
    h = pl_linear(x.reshape(B * T, Din), params["proj_w"], params["proj_b"])
    h = h.reshape(B, T, E)
    # Conformer stack (lengths are all full -> no key padding mask needed)
    for lp in params["layers"]:
        h = conformer_layer(h, lp, cfg["num_heads"])
    # TODO(synk): mean-over-time pooling stays in JAX glue.
    return jnp.mean(h, axis=1)


# ---------------------------------------------------------------------------
# Main
# ---------------------------------------------------------------------------

if __name__ == "__main__":
    cfg = dict(
        input_dim=8,
        encoder_dim=32,
        num_layers=2,
        num_heads=4,
        depthwise_conv_kernel_size=31,
    )
    assert cfg["encoder_dim"] % cfg["num_heads"] == 0

    params = build_params(jax.random.PRNGKey(0), cfg)

    k_in, _ = jax.random.split(jax.random.PRNGKey(0))
    B, T = 2, 8
    speech = jax.random.normal(k_in, (B, T, cfg["input_dim"]), F32)

    fwd = jax.jit(lambda p, s: speech_encoder(s, p, cfg))
    out = fwd(params, speech)
    out = jax.block_until_ready(out)

    assert out.shape == (B, cfg["encoder_dim"]), out.shape
    assert bool(jnp.all(jnp.isfinite(out)))
    print("KERNEL_OK")
</pallas_src>

<mosaic_0001>
module attributes {stable_mosaic.version = 11 : i64} {
  func.func @_matmul_kernel(%arg0: i32, %arg1: i32, %arg2: i32, %arg3: memref<16x8xbf16, #tpu.memory_space<vmem>>, %arg4: memref<8x32xbf16, #tpu.memory_space<vmem>>, %arg5: memref<1x32xf32, #tpu.memory_space<vmem>>, %arg6: memref<16x32xf32, #tpu.memory_space<vmem>>) attributes {dimension_semantics = [#tpu.dimension_semantics<parallel>, #tpu.dimension_semantics<parallel>, #tpu.dimension_semantics<arbitrary>], iteration_bounds = array<i64: 1, 1, 1>, scalar_prefetch = 0 : i64, scratch_operands = 0 : i64, tpu.core_type = #tpu.core_type<tc>, window_params = [{transform_indices = @transform_0, window_bounds = array<i64: 16, 8>}, {transform_indices = @transform_1, window_bounds = array<i64: 8, 32>}, {transform_indices = @transform_2, window_bounds = array<i64: 1, 32>}, {transform_indices = @transform_3, window_bounds = array<i64: 16, 32>}]} {
    %c0_i32 = arith.constant 0 : i32
    %0 = arith.cmpi eq, %arg2, %c0_i32 : i32
    %1 = arith.extui %0 : i1 to i32
    %c0_i32_0 = arith.constant 0 : i32
    %2 = arith.cmpi ne, %1, %c0_i32_0 : i32
    scf.if %2 {
      %cst_10 = arith.constant 0.000000e+00 : f32
      %12 = vector.broadcast %cst_10 : f32 to vector<16x32xf32>
      %c0_11 = arith.constant 0 : index
      %c0_12 = arith.constant 0 : index
      %13 = vector.load %arg6[%c0_11, %c0_12] : memref<16x32xf32, #tpu.memory_space<vmem>>, vector<16x32xf32>
      tpu.vector_store %arg6[%c0_11, %c0_12], %12 {strides = array<i32>} : memref<16x32xf32, #tpu.memory_space<vmem>>, vector<16x32xf32>,
    } else {
    }
    %c0 = arith.constant 0 : index
    %c0_1 = arith.constant 0 : index
    %3 = vector.load %arg6[%c0, %c0_1] : memref<16x32xf32, #tpu.memory_space<vmem>>, vector<16x32xf32>
    %c0_2 = arith.constant 0 : index
    %c0_3 = arith.constant 0 : index
    %4 = vector.load %arg3[%c0_2, %c0_3] : memref<16x8xbf16, #tpu.memory_space<vmem>>, vector<16x8xbf16>
    %c0_4 = arith.constant 0 : index
    %c0_5 = arith.constant 0 : index
    %5 = vector.load %arg4[%c0_4, %c0_5] : memref<8x32xbf16, #tpu.memory_space<vmem>>, vector<8x32xbf16>
    %cst = arith.constant dense<0.000000e+00> : vector<16x32xf32>
    %6 = tpu.matmul %4, %5, %cst {dimension_numbers = #tpu.dot_dimension_numbers<[1], [0], [0], [1], [0, 0, 1, 1], [], []>} : vector<16x8xbf16>, vector<8x32xbf16>, vector<16x32xf32> -> vector<16x32xf32>
    %7 = arith.addf %3, %6 : vector<16x32xf32>
    %c0_6 = arith.constant 0 : index
    %c0_7 = arith.constant 0 : index
    %8 = vector.load %arg6[%c0_6, %c0_7] : memref<16x32xf32, #tpu.memory_space<vmem>>, vector<16x32xf32>
    tpu.vector_store %arg6[%c0_6, %c0_7], %7 {strides = array<i32>} : memref<16x32xf32, #tpu.memory_space<vmem>>, vector<16x32xf32>,
    %c0_i32_8 = arith.constant 0 : i32
    %9 = arith.cmpi eq, %arg2, %c0_i32_8 : i32
    %10 = arith.extui %9 : i1 to i32
    %c0_i32_9 = arith.constant 0 : i32
    %11 = arith.cmpi ne, %10, %c0_i32_9 : i32
    scf.if %11 {
      %c0_10 = arith.constant 0 : index
      %c0_11 = arith.constant 0 : index
      %12 = vector.load %arg6[%c0_10, %c0_11] : memref<16x32xf32, #tpu.memory_space<vmem>>, vector<16x32xf32>
      %c0_12 = arith.constant 0 : index
      %c0_13 = arith.constant 0 : index
      %13 = vector.load %arg5[%c0_12, %c0_13] : memref<1x32xf32, #tpu.memory_space<vmem>>, vector<1x32xf32>
      %14 = vector.broadcast %13 : vector<1x32xf32> to vector<16x32xf32>
      %15 = arith.addf %12, %14 : vector<16x32xf32>
      %c0_14 = arith.constant 0 : index
      %c0_15 = arith.constant 0 : index
      %16 = vector.load %arg6[%c0_14, %c0_15] : memref<16x32xf32, #tpu.memory_space<vmem>>, vector<16x32xf32>
      tpu.vector_store %arg6[%c0_14, %c0_15], %15 {strides = array<i32>} : memref<16x32xf32, #tpu.memory_space<vmem>>, vector<16x32xf32>,
    } else {
    }
    return
  }
  func.func @transform_0(%arg0: i32, %arg1: i32, %arg2: i32) -> (i32, i32) {
    %c0_i32 = arith.constant 0 : i32
    return %arg0, %arg2 : i32, i32
  }
  func.func @transform_1(%arg0: i32, %arg1: i32, %arg2: i32) -> (i32, i32) {
    %c0_i32 = arith.constant 0 : i32
    return %arg2, %arg1 : i32, i32
  }
  func.func @transform_2(%arg0: i32, %arg1: i32, %arg2: i32) -> (i32, i32) {
    %c0_i32 = arith.constant 0 : i32
    %c0_i32_0 = arith.constant 0 : i32
    return %c0_i32, %arg1 : i32, i32
  }
  func.func @transform_3(%arg0: i32, %arg1: i32, %arg2: i32) -> (i32, i32) {
    %c0_i32 = arith.constant 0 : i32
    return %arg0, %arg1 : i32, i32
  }
}

module attributes {stable_mosaic.version = 11 : i64} {
  func.func @_ln_matmul_kernel(%arg0: i32, %arg1: memref<16x32xf32, #tpu.memory_space<vmem>>, %arg2: memref<1x32xf32, #tpu.memory_space<vmem>>, %arg3: memref<1x32xf32, #tpu.memory_space<vmem>>, %arg4: memref<32x96xbf16, #tpu.memory_space<vmem>>, %arg5: memref<1x96xf32, #tpu.memory_space<vmem>>, %arg6: memref<16x96xf32, #tpu.memory_space<vmem>>) attributes {dimension_semantics = [#tpu.dimension_semantics<parallel>], iteration_bounds = array<i64: 1>, scalar_prefetch = 0 : i64, scratch_operands = 0 : i64, tpu.core_type = #tpu.core_type<tc>, window_params = [{transform_indices = @transform_0, window_bounds = array<i64: 16, 32>}, {pipeline_mode = #tpu.pipeline_mode<synchronous>, transform_indices = @transform_1, window_bounds = array<i64: 1, 32>}, {pipeline_mode = #tpu.pipeline_mode<synchronous>, transform_indices = @transform_2, window_bounds = array<i64: 1, 32>}, {pipeline_mode = #tpu.pipeline_mode<synchronous>, transform_indices = @transform_3, window_bounds = array<i64: 32, 96>}, {pipeline_mode = #tpu.pipeline_mode<synchronous>, transform_indices = @transform_4, window_bounds = array<i64: 1, 96>}, {transform_indices = @transform_5, window_bounds = array<i64: 16, 96>}]} {
    %c0 = arith.constant 0 : index
    %c0_0 = arith.constant 0 : index
    %0 = vector.load %arg1[%c0, %c0_0] : memref<16x32xf32, #tpu.memory_space<vmem>>, vector<16x32xf32>
    %cst = arith.constant dense<0.000000e+00> : vector<16xf32>
    %1 = vector.multi_reduction <add>, %0, %cst [1] : vector<16x32xf32> to vector<16xf32>
    %2 = vector.shape_cast %1 : vector<16xf32> to vector<16x1xf32>
    %cst_1 = arith.constant 3.200000e+01 : f32
    %3 = vector.broadcast %cst_1 : f32 to vector<16x1xf32>
    %4 = arith.divf %2, %3 : vector<16x1xf32>
    %5 = vector.broadcast %4 : vector<16x1xf32> to vector<16x32xf32>
    %6 = arith.subf %0, %5 : vector<16x32xf32>
    %7 = arith.mulf %6, %6 : vector<16x32xf32>
    %cst_2 = arith.constant dense<0.000000e+00> : vector<16xf32>
    %8 = vector.multi_reduction <add>, %7, %cst_2 [1] : vector<16x32xf32> to vector<16xf32>
    %9 = vector.shape_cast %8 : vector<16xf32> to vector<16x1xf32>
    %cst_3 = arith.constant 3.200000e+01 : f32
    %10 = vector.broadcast %cst_3 : f32 to vector<16x1xf32>
    %11 = arith.divf %9, %10 : vector<16x1xf32>
    %12 = vector.broadcast %4 : vector<16x1xf32> to vector<16x32xf32>
    %13 = arith.subf %0, %12 : vector<16x32xf32>
    %cst_4 = arith.constant 9.99999974E-6 : f32
    %14 = vector.broadcast %cst_4 : f32 to vector<16x1xf32>
    %15 = arith.addf %11, %14 : vector<16x1xf32>
    %16 = math.rsqrt %15 : vector<16x1xf32>
    %17 = vector.broadcast %16 : vector<16x1xf32> to vector<16x32xf32>
    %18 = arith.mulf %13, %17 : vector<16x32xf32>
    %c0_5 = arith.constant 0 : index
    %c0_6 = arith.constant 0 : index
    %19 = vector.load %arg2[%c0_5, %c0_6] : memref<1x32xf32, #tpu.memory_space<vmem>>, vector<1x32xf32>
    %20 = vector.broadcast %19 : vector<1x32xf32> to vector<16x32xf32>
    %21 = arith.mulf %18, %20 : vector<16x32xf32>
    %c0_7 = arith.constant 0 : index
    %c0_8 = arith.constant 0 : index
    %22 = vector.load %arg3[%c0_7, %c0_8] : memref<1x32xf32, #tpu.memory_space<vmem>>, vector<1x32xf32>
    %23 = vector.broadcast %22 : vector<1x32xf32> to vector<16x32xf32>
    %24 = arith.addf %21, %23 : vector<16x32xf32>
    %25 = arith.truncf %24 : vector<16x32xf32> to vector<16x32xbf16>
    %c0_9 = arith.constant 0 : index
    %c0_10 = arith.constant 0 : index
    %26 = vector.load %arg4[%c0_9, %c0_10] : memref<32x96xbf16, #tpu.memory_space<vmem>>, vector<32x96xbf16>
    %cst_11 = arith.constant dense<0.000000e+00> : vector<16x96xf32>
    %27 = tpu.matmul %25, %26, %cst_11 {dimension_numbers = #tpu.dot_dimension_numbers<[1], [0], [0], [1], [0, 0, 1, 1], [], []>} : vector<16x32xbf16>, vector<32x96xbf16>, vector<16x96xf32> -> vector<16x96xf32>
    %c0_12 = arith.constant 0 : index
    %c0_13 = arith.constant 0 : index
    %28 = vector.load %arg5[%c0_12, %c0_13] : memref<1x96xf32, #tpu.memory_space<vmem>>, vector<1x96xf32>
    %29 = vector.broadcast %28 : vector<1x96xf32> to vector<16x96xf32>
    %30 = arith.addf %27, %29 : vector<16x96xf32>
    %c0_14 = arith.constant 0 : index
    %c0_15 = arith.constant 0 : index
    %31 = vector.load %arg6[%c0_14, %c0_15] : memref<16x96xf32, #tpu.memory_space<vmem>>, vector<16x96xf32>
    tpu.vector_store %arg6[%c0_14, %c0_15], %30 {strides = array<i32>} : memref<16x96xf32, #tpu.memory_space<vmem>>, vector<16x96xf32>,
    return
  }
  func.func @transform_0(%arg0: i32) -> (i32, i32) {
    %c0_i32 = arith.constant 0 : i32
    %c0_i32_0 = arith.constant 0 : i32
    return %arg0, %c0_i32 : i32, i32
  }
  func.func @transform_1(%arg0: i32) -> (i32, i32) {
    %c0_i32 = arith.constant 0 : i32
    %c0_i32_0 = arith.constant 0 : i32
    %c0_i32_1 = arith.constant 0 : i32
    return %c0_i32, %c0_i32_0 : i32, i32
  }
  func.func @transform_2(%arg0: i32) -> (i32, i32) {
    %c0_i32 = arith.constant 0 : i32
    %c0_i32_0 = arith.constant 0 : i32
    %c0_i32_1 = arith.constant 0 : i32
    return %c0_i32, %c0_i32_0 : i32, i32
  }
  func.func @transform_3(%arg0: i32) -> (i32, i32) {
    %c0_i32 = arith.constant 0 : i32
    %c0_i32_0 = arith.constant 0 : i32
    %c0_i32_1 = arith.constant 0 : i32
    return %c0_i32, %c0_i32_0 : i32, i32
  }
  func.func @transform_4(%arg0: i32) -> (i32, i32) {
    %c0_i32 = arith.constant 0 : i32
    %c0_i32_0 = arith.constant 0 : i32
    %c0_i32_1 = arith.constant 0 : i32
    return %c0_i32, %c0_i32_0 : i32, i32
  }
  func.func @transform_5(%arg0: i32) -> (i32, i32) {
    %c0_i32 = arith.constant 0 : i32
    %c0_i32_0 = arith.constant 0 : i32
    return %arg0, %c0_i32 : i32, i32
  }
}

module attributes {stable_mosaic.version = 11 : i64} {
  func.func @_ffn_kernel(%arg0: i32, %arg1: memref<16x32xf32, #tpu.memory_space<vmem>>, %arg2: memref<1x32xf32, #tpu.memory_space<vmem>>, %arg3: memref<1x32xf32, #tpu.memory_space<vmem>>, %arg4: memref<32x32xbf16, #tpu.memory_space<vmem>>, %arg5: memref<1x32xf32, #tpu.memory_space<vmem>>, %arg6: memref<32x32xbf16, #tpu.memory_space<vmem>>, %arg7: memref<1x32xf32, #tpu.memory_space<vmem>>, %arg8: memref<16x32xf32, #tpu.memory_space<vmem>>) attributes {dimension_semantics = [#tpu.dimension_semantics<parallel>], iteration_bounds = array<i64: 1>, scalar_prefetch = 0 : i64, scratch_operands = 0 : i64, tpu.core_type = #tpu.core_type<tc>, window_params = [{transform_indices = @transform_0, window_bounds = array<i64: 16, 32>}, {pipeline_mode = #tpu.pipeline_mode<synchronous>, transform_indices = @transform_1, window_bounds = array<i64: 1, 32>}, {pipeline_mode = #tpu.pipeline_mode<synchronous>, transform_indices = @transform_2, window_bounds = array<i64: 1, 32>}, {pipeline_mode = #tpu.pipeline_mode<synchronous>, transform_indices = @transform_3, window_bounds = array<i64: 32, 32>}, {pipeline_mode = #tpu.pipeline_mode<synchronous>, transform_indices = @transform_4, window_bounds = array<i64: 1, 32>}, {pipeline_mode = #tpu.pipeline_mode<synchronous>, transform_indices = @transform_5, window_bounds = array<i64: 32, 32>}, {pipeline_mode = #tpu.pipeline_mode<synchronous>, transform_indices = @transform_6, window_bounds = array<i64: 1, 32>}, {transform_indices = @transform_7, window_bounds = array<i64: 16, 32>}]} {
    %c0 = arith.constant 0 : index
    %c0_0 = arith.constant 0 : index
    %0 = vector.load %arg1[%c0, %c0_0] : memref<16x32xf32, #tpu.memory_space<vmem>>, vector<16x32xf32>
    %cst = arith.constant dense<0.000000e+00> : vector<16xf32>
    %1 = vector.multi_reduction <add>, %0, %cst [1] : vector<16x32xf32> to vector<16xf32>
    %2 = vector.shape_cast %1 : vector<16xf32> to vector<16x1xf32>
    %cst_1 = arith.constant 3.200000e+01 : f32
    %3 = vector.broadcast %cst_1 : f32 to vector<16x1xf32>
    %4 = arith.divf %2, %3 : vector<16x1xf32>
    %5 = vector.broadcast %4 : vector<16x1xf32> to vector<16x32xf32>
    %6 = arith.subf %0, %5 : vector<16x32xf32>
    %7 = arith.mulf %6, %6 : vector<16x32xf32>
    %cst_2 = arith.constant dense<0.000000e+00> : vector<16xf32>
    %8 = vector.multi_reduction <add>, %7, %cst_2 [1] : vector<16x32xf32> to vector<16xf32>
    %9 = vector.shape_cast %8 : vector<16xf32> to vector<16x1xf32>
    %cst_3 = arith.constant 3.200000e+01 : f32
    %10 = vector.broadcast %cst_3 : f32 to vector<16x1xf32>
    %11 = arith.divf %9, %10 : vector<16x1xf32>
    %12 = vector.broadcast %4 : vector<16x1xf32> to vector<16x32xf32>
    %13 = arith.subf %0, %12 : vector<16x32xf32>
    %cst_4 = arith.constant 9.99999974E-6 : f32
    %14 = vector.broadcast %cst_4 : f32 to vector<16x1xf32>
    %15 = arith.addf %11, %14 : vector<16x1xf32>
    %16 = math.rsqrt %15 : vector<16x1xf32>
    %17 = vector.broadcast %16 : vector<16x1xf32> to vector<16x32xf32>
    %18 = arith.mulf %13, %17 : vector<16x32xf32>
    %c0_5 = arith.constant 0 : index
    %c0_6 = arith.constant 0 : index
    %19 = vector.load %arg2[%c0_5, %c0_6] : memref<1x32xf32, #tpu.memory_space<vmem>>, vector<1x32xf32>
    %20 = vector.broadcast %19 : vector<1x32xf32> to vector<16x32xf32>
    %21 = arith.mulf %18, %20 : vector<16x32xf32>
    %c0_7 = arith.constant 0 : index
    %c0_8 = arith.constant 0 : index
    %22 = vector.load %arg3[%c0_7, %c0_8] : memref<1x32xf32, #tpu.memory_space<vmem>>, vector<1x32xf32>
    %23 = vector.broadcast %22 : vector<1x32xf32> to vector<16x32xf32>
    %24 = arith.addf %21, %23 : vector<16x32xf32>
    %25 = arith.truncf %24 : vector<16x32xf32> to vector<16x32xbf16>
    %c0_9 = arith.constant 0 : index
    %c0_10 = arith.constant 0 : index
    %26 = vector.load %arg4[%c0_9, %c0_10] : memref<32x32xbf16, #tpu.memory_space<vmem>>, vector<32x32xbf16>
    %cst_11 = arith.constant dense<0.000000e+00> : vector<16x32xf32>
    %27 = tpu.matmul %25, %26, %cst_11 {dimension_numbers = #tpu.dot_dimension_numbers<[1], [0], [0], [1], [0, 0, 1, 1], [], []>} : vector<16x32xbf16>, vector<32x32xbf16>, vector<16x32xf32> -> vector<16x32xf32>
    %c0_12 = arith.constant 0 : index
    %c0_13 = arith.constant 0 : index
    %28 = vector.load %arg5[%c0_12, %c0_13] : memref<1x32xf32, #tpu.memory_space<vmem>>, vector<1x32xf32>
    %29 = vector.broadcast %28 : vector<1x32xf32> to vector<16x32xf32>
    %30 = arith.addf %27, %29 : vector<16x32xf32>
    %31 = arith.negf %30 : vector<16x32xf32>
    %32 = math.exp %31 : vector<16x32xf32>
    %cst_14 = arith.constant 1.000000e+00 : f32
    %33 = vector.broadcast %cst_14 : f32 to vector<16x32xf32>
    %34 = arith.addf %33, %32 : vector<16x32xf32>
    %35 = arith.divf %33, %34 : vector<16x32xf32>
    %36 = arith.mulf %30, %35 : vector<16x32xf32>
    %37 = arith.truncf %36 : vector<16x32xf32> to vector<16x32xbf16>
    %c0_15 = arith.constant 0 : index
    %c0_16 = arith.constant 0 : index
    %38 = vector.load %arg6[%c0_15, %c0_16] : memref<32x32xbf16, #tpu.memory_space<vmem>>, vector<32x32xbf16>
    %cst_17 = arith.constant dense<0.000000e+00> : vector<16x32xf32>
    %39 = tpu.matmul %37, %38, %cst_17 {dimension_numbers = #tpu.dot_dimension_numbers<[1], [0], [0], [1], [0, 0, 1, 1], [], []>} : vector<16x32xbf16>, vector<32x32xbf16>, vector<16x32xf32> -> vector<16x32xf32>
    %c0_18 = arith.constant 0 : index
    %c0_19 = arith.constant 0 : index
    %40 = vector.load %arg7[%c0_18, %c0_19] : memref<1x32xf32, #tpu.memory_space<vmem>>, vector<1x32xf32>
    %41 = vector.broadcast %40 : vector<1x32xf32> to vector<16x32xf32>
    %42 = arith.addf %39, %41 : vector<16x32xf32>
    %cst_20 = arith.constant 5.000000e-01 : f32
    %43 = vector.broadcast %cst_20 : f32 to vector<16x32xf32>
    %44 = arith.mulf %43, %42 : vector<16x32xf32>
    %45 = arith.addf %0, %44 : vector<16x32xf32>
    %c0_21 = arith.constant 0 : index
    %c0_22 = arith.constant 0 : index
    %46 = vector.load %arg8[%c0_21, %c0_22] : memref<16x32xf32, #tpu.memory_space<vmem>>, vector<16x32xf32>
    tpu.vector_store %arg8[%c0_21, %c0_22], %45 {strides = array<i32>} : memref<16x32xf32, #tpu.memory_space<vmem>>, vector<16x32xf32>,
    return
  }
  func.func @transform_0(%arg0: i32) -> (i32, i32) {
    %c0_i32 = arith.constant 0 : i32
    %c0_i32_0 = arith.constant 0 : i32
    return %arg0, %c0_i32 : i32, i32
  }
  func.func @transform_1(%arg0: i32) -> (i32, i32) {
    %c0_i32 = arith.constant 0 : i32
    %c0_i32_0 = arith.constant 0 : i32
    %c0_i32_1 = arith.constant 0 : i32
    return %c0_i32, %c0_i32_0 : i32, i32
  }
  func.func @transform_2(%arg0: i32) -> (i32, i32) {
    %c0_i32 = arith.constant 0 : i32
    %c0_i32_0 = arith.constant 0 : i32
    %c0_i32_1 = arith.constant 0 : i32
    return %c0_i32, %c0_i32_0 : i32, i32
  }
  func.func @transform_3(%arg0: i32) -> (i32, i32) {
    %c0_i32 = arith.constant 0 : i32
    %c0_i32_0 = arith.constant 0 : i32
    %c0_i32_1 = arith.constant 0 : i32
    return %c0_i32, %c0_i32_0 : i32, i32
  }
  func.func @transform_4(%arg0: i32) -> (i32, i32) {
    %c0_i32 = arith.constant 0 : i32
    %c0_i32_0 = arith.constant 0 : i32
    %c0_i32_1 = arith.constant 0 : i32
    return %c0_i32, %c0_i32_0 : i32, i32
  }
  func.func @transform_5(%arg0: i32) -> (i32, i32) {
    %c0_i32 = arith.constant 0 : i32
    %c0_i32_0 = arith.constant 0 : i32
    %c0_i32_1 = arith.constant 0 : i32
    return %c0_i32, %c0_i32_0 : i32, i32
  }
  func.func @transform_6(%arg0: i32) -> (i32, i32) {
    %c0_i32 = arith.constant 0 : i32
    %c0_i32_0 = arith.constant 0 : i32
    %c0_i32_1 = arith.constant 0 : i32
    return %c0_i32, %c0_i32_0 : i32, i32
  }
  func.func @transform_7(%arg0: i32) -> (i32, i32) {
    %c0_i32 = arith.constant 0 : i32
    %c0_i32_0 = arith.constant 0 : i32
    return %arg0, %c0_i32 : i32, i32
  }
}

module attributes {stable_mosaic.version = 11 : i64} {
  func.func @_attn_kernel(%arg0: i32, %arg1: memref<1x8x32xf32, #tpu.memory_space<vmem>>, %arg2: memref<1x8x32xf32, #tpu.memory_space<vmem>>, %arg3: memref<1x8x32xf32, #tpu.memory_space<vmem>>, %arg4: memref<1x8x32xf32, #tpu.memory_space<vmem>>) attributes {dimension_semantics = [#tpu.dimension_semantics<parallel>], iteration_bounds = array<i64: 2>, scalar_prefetch = 0 : i64, scratch_operands = 0 : i64, tpu.core_type = #tpu.core_type<tc>, window_params = [{transform_indices = @transform_0, window_bounds = array<i64: 1, 8, 32>}, {transform_indices = @transform_1, window_bounds = array<i64: 1, 8, 32>}, {transform_indices = @transform_2, window_bounds = array<i64: 1, 8, 32>}, {transform_indices = @transform_3, window_bounds = array<i64: 1, 8, 32>}]} {
    %c0 = arith.constant 0 : index
    %c0_0 = arith.constant 0 : index
    %c0_1 = arith.constant 0 : index
    %0 = vector.load %arg1[%c0, %c0_0, %c0_1] : memref<1x8x32xf32, #tpu.memory_space<vmem>>, vector<1x8x32xf32>
    %1 = vector.shape_cast %0 : vector<1x8x32xf32> to vector<8x32xf32>
    %c0_2 = arith.constant 0 : index
    %c0_3 = arith.constant 0 : index
    %c0_4 = arith.constant 0 : index
    %2 = vector.load %arg2[%c0_2, %c0_3, %c0_4] : memref<1x8x32xf32, #tpu.memory_space<vmem>>, vector<1x8x32xf32>
    %3 = vector.shape_cast %2 : vector<1x8x32xf32> to vector<8x32xf32>
    %c0_5 = arith.constant 0 : index
    %c0_6 = arith.constant 0 : index
    %c0_7 = arith.constant 0 : index
    %4 = vector.load %arg3[%c0_5, %c0_6, %c0_7] : memref<1x8x32xf32, #tpu.memory_space<vmem>>, vector<1x8x32xf32>
    %5 = vector.shape_cast %4 : vector<1x8x32xf32> to vector<8x32xf32>
    %6 = vector.extract_strided_slice %1 {offsets = [0, 0], sizes = [8, 8], strides = [1, 1]} : vector<8x32xf32> to vector<8x8xf32>
    %7 = vector.extract_strided_slice %3 {offsets = [0, 0], sizes = [8, 8], strides = [1, 1]} : vector<8x32xf32> to vector<8x8xf32>
    %cst = arith.constant dense<0.000000e+00> : vector<8x8xf32>
    %8 = tpu.matmul %6, %7, %cst {dimension_numbers = #tpu.dot_dimension_numbers<[1], [1], [0], [0], [0, 0, 1, 0], [], []>} : vector<8x8xf32>, vector<8x8xf32>, vector<8x8xf32> -> vector<8x8xf32>
    %cst_8 = arith.constant 0.353553385 : f32
    %9 = vector.broadcast %cst_8 : f32 to vector<8x8xf32>
    %10 = arith.mulf %8, %9 : vector<8x8xf32>
    %cst_9 = arith.constant dense<0xFF800000> : vector<8xf32>
    %11 = vector.multi_reduction <maximumf>, %10, %cst_9 [1] : vector<8x8xf32> to vector<8xf32>
    %12 = vector.shape_cast %11 : vector<8xf32> to vector<8x1xf32>
    %13 = vector.broadcast %12 : vector<8x1xf32> to vector<8x8xf32>
    %14 = arith.subf %10, %13 : vector<8x8xf32>
    %15 = math.exp %14 : vector<8x8xf32>
    %cst_10 = arith.constant dense<0.000000e+00> : vector<8xf32>
    %16 = vector.multi_reduction <add>, %15, %cst_10 [1] : vector<8x8xf32> to vector<8xf32>
    %17 = vector.shape_cast %16 : vector<8xf32> to vector<8x1xf32>
    %18 = tpu.reciprocal %17 {approx = true} : vector<8x1xf32> -> vector<8x1xf32>
    %19 = vector.broadcast %18 : vector<8x1xf32> to vector<8x8xf32>
    %20 = arith.mulf %15, %19 : vector<8x8xf32>
    %21 = vector.extract_strided_slice %5 {offsets = [0, 0], sizes = [8, 8], strides = [1, 1]} : vector<8x32xf32> to vector<8x8xf32>
    %cst_11 = arith.constant dense<0.000000e+00> : vector<8x8xf32>
    %22 = tpu.matmul %20, %21, %cst_11 {dimension_numbers = #tpu.dot_dimension_numbers<[1], [0], [0], [1], [0, 0, 1, 1], [], []>} : vector<8x8xf32>, vector<8x8xf32>, vector<8x8xf32> -> vector<8x8xf32>
    %23 = vector.extract_strided_slice %1 {offsets = [0, 8], sizes = [8, 8], strides = [1, 1]} : vector<8x32xf32> to vector<8x8xf32>
    %24 = vector.extract_strided_slice %3 {offsets = [0, 8], sizes = [8, 8], strides = [1, 1]} : vector<8x32xf32> to vector<8x8xf32>
    %cst_12 = arith.constant dense<0.000000e+00> : vector<8x8xf32>
    %25 = tpu.matmul %23, %24, %cst_12 {dimension_numbers = #tpu.dot_dimension_numbers<[1], [1], [0], [0], [0, 0, 1, 0], [], []>} : vector<8x8xf32>, vector<8x8xf32>, vector<8x8xf32> -> vector<8x8xf32>
    %cst_13 = arith.constant 0.353553385 : f32
    %26 = vector.broadcast %cst_13 : f32 to vector<8x8xf32>
    %27 = arith.mulf %25, %26 : vector<8x8xf32>
    %cst_14 = arith.constant dense<0xFF800000> : vector<8xf32>
    %28 = vector.multi_reduction <maximumf>, %27, %cst_14 [1] : vector<8x8xf32> to vector<8xf32>
    %29 = vector.shape_cast %28 : vector<8xf32> to vector<8x1xf32>
    %30 = vector.broadcast %29 : vector<8x1xf32> to vector<8x8xf32>
    %31 = arith.subf %27, %30 : vector<8x8xf32>
    %32 = math.exp %31 : vector<8x8xf32>
    %cst_15 = arith.constant dense<0.000000e+00> : vector<8xf32>
    %33 = vector.multi_reduction <add>, %32, %cst_15 [1] : vector<8x8xf32> to vector<8xf32>
    %34 = vector.shape_cast %33 : vector<8xf32> to vector<8x1xf32>
    %35 = tpu.reciprocal %34 {approx = true} : vector<8x1xf32> -> vector<8x1xf32>
    %36 = vector.broadcast %35 : vector<8x1xf32> to vector<8x8xf32>
    %37 = arith.mulf %32, %36 : vector<8x8xf32>
    %38 = vector.extract_strided_slice %5 {offsets = [0, 8], sizes = [8, 8], strides = [1, 1]} : vector<8x32xf32> to vector<8x8xf32>
    %cst_16 = arith.constant dense<0.000000e+00> : vector<8x8xf32>
    %39 = tpu.matmul %37, %38, %cst_16 {dimension_numbers = #tpu.dot_dimension_numbers<[1], [0], [0], [1], [0, 0, 1, 1], [], []>} : vector<8x8xf32>, vector<8x8xf32>, vector<8x8xf32> -> vector<8x8xf32>
    %40 = vector.extract_strided_slice %1 {offsets = [0, 16], sizes = [8, 8], strides = [1, 1]} : vector<8x32xf32> to vector<8x8xf32>
    %41 = vector.extract_strided_slice %3 {offsets = [0, 16], sizes = [8, 8], strides = [1, 1]} : vector<8x32xf32> to vector<8x8xf32>
    %cst_17 = arith.constant dense<0.000000e+00> : vector<8x8xf32>
    %42 = tpu.matmul %40, %41, %cst_17 {dimension_numbers = #tpu.dot_dimension_numbers<[1], [1], [0], [0], [0, 0, 1, 0], [], []>} : vector<8x8xf32>, vector<8x8xf32>, vector<8x8xf32> -> vector<8x8xf32>
    %cst_18 = arith.constant 0.353553385 : f32
    %43 = vector.broadcast %cst_18 : f32 to vector<8x8xf32>
    %44 = arith.mulf %42, %43 : vector<8x8xf32>
    %cst_19 = arith.constant dense<0xFF800000> : vector<8xf32>
    %45 = vector.multi_reduction <maximumf>, %44, %cst_19 [1] : vector<8x8xf32> to vector<8xf32>
    %46 = vector.shape_cast %45 : vector<8xf32> to vector<8x1xf32>
    %47 = vector.broadcast %46 : vector<8x1xf32> to vector<8x8xf32>
    %48 = arith.subf %44, %47 : vector<8x8xf32>
    %49 = math.exp %48 : vector<8x8xf32>
    %cst_20 = arith.constant dense<0.000000e+00> : vector<8xf32>
    %50 = vector.multi_reduction <add>, %49, %cst_20 [1] : vector<8x8xf32> to vector<8xf32>
    %51 = vector.shape_cast %50 : vector<8xf32> to vector<8x1xf32>
    %52 = tpu.reciprocal %51 {approx = true} : vector<8x1xf32> -> vector<8x1xf32>
    %53 = vector.broadcast %52 : vector<8x1xf32> to vector<8x8xf32>
    %54 = arith.mulf %49, %53 : vector<8x8xf32>
    %55 = vector.extract_strided_slice %5 {offsets = [0, 16], sizes = [8, 8], strides = [1, 1]} : vector<8x32xf32> to vector<8x8xf32>
    %cst_21 = arith.constant dense<0.000000e+00> : vector<8x8xf32>
    %56 = tpu.matmul %54, %55, %cst_21 {dimension_numbers = #tpu.dot_dimension_numbers<[1], [0], [0], [1], [0, 0, 1, 1], [], []>} : vector<8x8xf32>, vector<8x8xf32>, vector<8x8xf32> -> vector<8x8xf32>
    %57 = vector.extract_strided_slice %1 {offsets = [0, 24], sizes = [8, 8], strides = [1, 1]} : vector<8x32xf32> to vector<8x8xf32>
    %58 = vector.extract_strided_slice %3 {offsets = [0, 24], sizes = [8, 8], strides = [1, 1]} : vector<8x32xf32> to vector<8x8xf32>
    %cst_22 = arith.constant dense<0.000000e+00> : vector<8x8xf32>
    %59 = tpu.matmul %57, %58, %cst_22 {dimension_numbers = #tpu.dot_dimension_numbers<[1], [1], [0], [0], [0, 0, 1, 0], [], []>} : vector<8x8xf32>, vector<8x8xf32>, vector<8x8xf32> -> vector<8x8xf32>
    %cst_23 = arith.constant 0.353553385 : f32
    %60 = vector.broadcast %cst_23 : f32 to vector<8x8xf32>
    %61 = arith.mulf %59, %60 : vector<8x8xf32>
    %cst_24 = arith.constant dense<0xFF800000> : vector<8xf32>
    %62 = vector.multi_reduction <maximumf>, %61, %cst_24 [1] : vector<8x8xf32> to vector<8xf32>
    %63 = vector.shape_cast %62 : vector<8xf32> to vector<8x1xf32>
    %64 = vector.broadcast %63 : vector<8x1xf32> to vector<8x8xf32>
    %65 = arith.subf %61, %64 : vector<8x8xf32>
    %66 = math.exp %65 : vector<8x8xf32>
    %cst_25 = arith.constant dense<0.000000e+00> : vector<8xf32>
    %67 = vector.multi_reduction <add>, %66, %cst_25 [1] : vector<8x8xf32> to vector<8xf32>
    %68 = vector.shape_cast %67 : vector<8xf32> to vector<8x1xf32>
    %69 = tpu.reciprocal %68 {approx = true} : vector<8x1xf32> -> vector<8x1xf32>
    %70 = vector.broadcast %69 : vector<8x1xf32> to vector<8x8xf32>
    %71 = arith.mulf %66, %70 : vector<8x8xf32>
    %72 = vector.extract_strided_slice %5 {offsets = [0, 24], sizes = [8, 8], strides = [1, 1]} : vector<8x32xf32> to vector<8x8xf32>
    %cst_26 = arith.constant dense<0.000000e+00> : vector<8x8xf32>
    %73 = tpu.matmul %71, %72, %cst_26 {dimension_numbers = #tpu.dot_dimension_numbers<[1], [0], [0], [1], [0, 0, 1, 1], [], []>} : vector<8x8xf32>, vector<8x8xf32>, vector<8x8xf32> -> vector<8x8xf32>
    %74 = tpu.concatenate %22, %39, %56, %73 in 1 : vector<8x8xf32>, vector<8x8xf32>, vector<8x8xf32>, vector<8x8xf32> -> vector<8x32xf32>
    %c0_27 = arith.constant 0 : index
    %c0_28 = arith.constant 0 : index
    %c0_29 = arith.constant 0 : index
    %75 = vector.load %arg4[%c0_27, %c0_28, %c0_29] : memref<1x8x32xf32, #tpu.memory_space<vmem>>, vector<1x8x32xf32>
    %76 = vector.shape_cast %75 : vector<1x8x32xf32> to vector<8x32xf32>
    %77 = vector.shape_cast %74 : vector<8x32xf32> to vector<1x8x32xf32>
    tpu.vector_store %arg4[%c0_27, %c0_28, %c0_29], %77 {strides = array<i32>} : memref<1x8x32xf32, #tpu.memory_space<vmem>>, vector<1x8x32xf32>,
    return
  }
  func.func @transform_0(%arg0: i32) -> (i32, i32, i32) {
    %c0_i32 = arith.constant 0 : i32
    %c0_i32_0 = arith.constant 0 : i32
    %c0_i32_1 = arith.constant 0 : i32
    return %arg0, %c0_i32, %c0_i32_0 : i32, i32, i32
  }
  func.func @transform_1(%arg0: i32) -> (i32, i32, i32) {
    %c0_i32 = arith.constant 0 : i32
    %c0_i32_0 = arith.constant 0 : i32
    %c0_i32_1 = arith.constant 0 : i32
    return %arg0, %c0_i32, %c0_i32_0 : i32, i32, i32
  }
  func.func @transform_2(%arg0: i32) -> (i32, i32, i32) {
    %c0_i32 = arith.constant 0 : i32
    %c0_i32_0 = arith.constant 0 : i32
    %c0_i32_1 = arith.constant 0 : i32
    return %arg0, %c0_i32, %c0_i32_0 : i32, i32, i32
  }
  func.func @transform_3(%arg0: i32) -> (i32, i32, i32) {
    %c0_i32 = arith.constant 0 : i32
    %c0_i32_0 = arith.constant 0 : i32
    %c0_i32_1 = arith.constant 0 : i32
    return %arg0, %c0_i32, %c0_i32_0 : i32, i32, i32
  }
}

module attributes {stable_mosaic.version = 11 : i64} {
  func.func @_matmul_kernel(%arg0: i32, %arg1: i32, %arg2: i32, %arg3: memref<16x32xbf16, #tpu.memory_space<vmem>>, %arg4: memref<32x32xbf16, #tpu.memory_space<vmem>>, %arg5: memref<1x32xf32, #tpu.memory_space<vmem>>, %arg6: memref<16x32xf32, #tpu.memory_space<vmem>>, %arg7: memref<16x32xf32, #tpu.memory_space<vmem>>) attributes {dimension_semantics = [#tpu.dimension_semantics<parallel>, #tpu.dimension_semantics<parallel>, #tpu.dimension_semantics<arbitrary>], iteration_bounds = array<i64: 1, 1, 1>, scalar_prefetch = 0 : i64, scratch_operands = 0 : i64, tpu.core_type = #tpu.core_type<tc>, window_params = [{transform_indices = @transform_0, window_bounds = array<i64: 16, 32>}, {transform_indices = @transform_1, window_bounds = array<i64: 32, 32>}, {transform_indices = @transform_2, window_bounds = array<i64: 1, 32>}, {transform_indices = @transform_3, window_bounds = array<i64: 16, 32>}, {transform_indices = @transform_4, window_bounds = array<i64: 16, 32>}]} {
    %c0_i32 = arith.constant 0 : i32
    %0 = arith.cmpi eq, %arg2, %c0_i32 : i32
    %1 = arith.extui %0 : i1 to i32
    %c0_i32_0 = arith.constant 0 : i32
    %2 = arith.cmpi ne, %1, %c0_i32_0 : i32
    scf.if %2 {
      %cst_10 = arith.constant 0.000000e+00 : f32
      %12 = vector.broadcast %cst_10 : f32 to vector<16x32xf32>
      %c0_11 = arith.constant 0 : index
      %c0_12 = arith.constant 0 : index
      %13 = vector.load %arg7[%c0_11, %c0_12] : memref<16x32xf32, #tpu.memory_space<vmem>>, vector<16x32xf32>
      tpu.vector_store %arg7[%c0_11, %c0_12], %12 {strides = array<i32>} : memref<16x32xf32, #tpu.memory_space<vmem>>, vector<16x32xf32>,
    } else {
    }
    %c0 = arith.constant 0 : index
    %c0_1 = arith.constant 0 : index
    %3 = vector.load %arg7[%c0, %c0_1] : memref<16x32xf32, #tpu.memory_space<vmem>>, vector<16x32xf32>
    %c0_2 = arith.constant 0 : index
    %c0_3 = arith.constant 0 : index
    %4 = vector.load %arg3[%c0_2, %c0_3] : memref<16x32xbf16, #tpu.memory_space<vmem>>, vector<16x32xbf16>
    %c0_4 = arith.constant 0 : index
    %c0_5 = arith.constant 0 : index
    %5 = vector.load %arg4[%c0_4, %c0_5] : memref<32x32xbf16, #tpu.memory_space<vmem>>, vector<32x32xbf16>
    %cst = arith.constant dense<0.000000e+00> : vector<16x32xf32>
    %6 = tpu.matmul %4, %5, %cst {dimension_numbers = #tpu.dot_dimension_numbers<[1], [0], [0], [1], [0, 0, 1, 1], [], []>} : vector<16x32xbf16>, vector<32x32xbf16>, vector<16x32xf32> -> vector<16x32xf32>
    %7 = arith.addf %3, %6 : vector<16x32xf32>
    %c0_6 = arith.constant 0 : index
    %c0_7 = arith.constant 0 : index
    %8 = vector.load %arg7[%c0_6, %c0_7] : memref<16x32xf32, #tpu.memory_space<vmem>>, vector<16x32xf32>
    tpu.vector_store %arg7[%c0_6, %c0_7], %7 {strides = array<i32>} : memref<16x32xf32, #tpu.memory_space<vmem>>, vector<16x32xf32>,
    %c0_i32_8 = arith.constant 0 : i32
    %9 = arith.cmpi eq, %arg2, %c0_i32_8 : i32
    %10 = arith.extui %9 : i1 to i32
    %c0_i32_9 = arith.constant 0 : i32
    %11 = arith.cmpi ne, %10, %c0_i32_9 : i32
    scf.if %11 {
      %c0_10 = arith.constant 0 : index
      %c0_11 = arith.constant 0 : index
      %12 = vector.load %arg7[%c0_10, %c0_11] : memref<16x32xf32, #tpu.memory_space<vmem>>, vector<16x32xf32>
      %c0_12 = arith.constant 0 : index
      %c0_13 = arith.constant 0 : index
      %13 = vector.load %arg5[%c0_12, %c0_13] : memref<1x32xf32, #tpu.memory_space<vmem>>, vector<1x32xf32>
      %14 = vector.broadcast %13 : vector<1x32xf32> to vector<16x32xf32>
      %15 = arith.addf %12, %14 : vector<16x32xf32>
      %c0_14 = arith.constant 0 : index
      %c0_15 = arith.constant 0 : index
      %16 = vector.load %arg6[%c0_14, %c0_15] : memref<16x32xf32, #tpu.memory_space<vmem>>, vector<16x32xf32>
      %17 = arith.addf %15, %16 : vector<16x32xf32>
      %c0_16 = arith.constant 0 : index
      %c0_17 = arith.constant 0 : index
      %18 = vector.load %arg7[%c0_16, %c0_17] : memref<16x32xf32, #tpu.memory_space<vmem>>, vector<16x32xf32>
      tpu.vector_store %arg7[%c0_16, %c0_17], %17 {strides = array<i32>} : memref<16x32xf32, #tpu.memory_space<vmem>>, vector<16x32xf32>,
    } else {
    }
    return
  }
  func.func @transform_0(%arg0: i32, %arg1: i32, %arg2: i32) -> (i32, i32) {
    %c0_i32 = arith.constant 0 : i32
    return %arg0, %arg2 : i32, i32
  }
  func.func @transform_1(%arg0: i32, %arg1: i32, %arg2: i32) -> (i32, i32) {
    %c0_i32 = arith.constant 0 : i32
    return %arg2, %arg1 : i32, i32
  }
  func.func @transform_2(%arg0: i32, %arg1: i32, %arg2: i32) -> (i32, i32) {
    %c0_i32 = arith.constant 0 : i32
    %c0_i32_0 = arith.constant 0 : i32
    return %c0_i32, %arg1 : i32, i32
  }
  func.func @transform_3(%arg0: i32, %arg1: i32, %arg2: i32) -> (i32, i32) {
    %c0_i32 = arith.constant 0 : i32
    return %arg0, %arg1 : i32, i32
  }
  func.func @transform_4(%arg0: i32, %arg1: i32, %arg2: i32) -> (i32, i32) {
    %c0_i32 = arith.constant 0 : i32
    return %arg0, %arg1 : i32, i32
  }
}

module attributes {stable_mosaic.version = 11 : i64} {
  func.func @_ln_matmul_kernel(%arg0: i32, %arg1: memref<16x32xf32, #tpu.memory_space<vmem>>, %arg2: memref<1x32xf32, #tpu.memory_space<vmem>>, %arg3: memref<1x32xf32, #tpu.memory_space<vmem>>, %arg4: memref<32x64xbf16, #tpu.memory_space<vmem>>, %arg5: memref<1x64xf32, #tpu.memory_space<vmem>>, %arg6: memref<16x32xf32, #tpu.memory_space<vmem>>) attributes {dimension_semantics = [#tpu.dimension_semantics<parallel>], iteration_bounds = array<i64: 1>, scalar_prefetch = 0 : i64, scratch_operands = 0 : i64, tpu.core_type = #tpu.core_type<tc>, window_params = [{transform_indices = @transform_0, window_bounds = array<i64: 16, 32>}, {pipeline_mode = #tpu.pipeline_mode<synchronous>, transform_indices = @transform_1, window_bounds = array<i64: 1, 32>}, {pipeline_mode = #tpu.pipeline_mode<synchronous>, transform_indices = @transform_2, window_bounds = array<i64: 1, 32>}, {pipeline_mode = #tpu.pipeline_mode<synchronous>, transform_indices = @transform_3, window_bounds = array<i64: 32, 64>}, {pipeline_mode = #tpu.pipeline_mode<synchronous>, transform_indices = @transform_4, window_bounds = array<i64: 1, 64>}, {transform_indices = @transform_5, window_bounds = array<i64: 16, 32>}]} {
    %c0 = arith.constant 0 : index
    %c0_0 = arith.constant 0 : index
    %0 = vector.load %arg1[%c0, %c0_0] : memref<16x32xf32, #tpu.memory_space<vmem>>, vector<16x32xf32>
    %cst = arith.constant dense<0.000000e+00> : vector<16xf32>
    %1 = vector.multi_reduction <add>, %0, %cst [1] : vector<16x32xf32> to vector<16xf32>
    %2 = vector.shape_cast %1 : vector<16xf32> to vector<16x1xf32>
    %cst_1 = arith.constant 3.200000e+01 : f32
    %3 = vector.broadcast %cst_1 : f32 to vector<16x1xf32>
    %4 = arith.divf %2, %3 : vector<16x1xf32>
    %5 = vector.broadcast %4 : vector<16x1xf32> to vector<16x32xf32>
    %6 = arith.subf %0, %5 : vector<16x32xf32>
    %7 = arith.mulf %6, %6 : vector<16x32xf32>
    %cst_2 = arith.constant dense<0.000000e+00> : vector<16xf32>
    %8 = vector.multi_reduction <add>, %7, %cst_2 [1] : vector<16x32xf32> to vector<16xf32>
    %9 = vector.shape_cast %8 : vector<16xf32> to vector<16x1xf32>
    %cst_3 = arith.constant 3.200000e+01 : f32
    %10 = vector.broadcast %cst_3 : f32 to vector<16x1xf32>
    %11 = arith.divf %9, %10 : vector<16x1xf32>
    %12 = vector.broadcast %4 : vector<16x1xf32> to vector<16x32xf32>
    %13 = arith.subf %0, %12 : vector<16x32xf32>
    %cst_4 = arith.constant 9.99999974E-6 : f32
    %14 = vector.broadcast %cst_4 : f32 to vector<16x1xf32>
    %15 = arith.addf %11, %14 : vector<16x1xf32>
    %16 = math.rsqrt %15 : vector<16x1xf32>
    %17 = vector.broadcast %16 : vector<16x1xf32> to vector<16x32xf32>
    %18 = arith.mulf %13, %17 : vector<16x32xf32>
    %c0_5 = arith.constant 0 : index
    %c0_6 = arith.constant 0 : index
    %19 = vector.load %arg2[%c0_5, %c0_6] : memref<1x32xf32, #tpu.memory_space<vmem>>, vector<1x32xf32>
    %20 = vector.broadcast %19 : vector<1x32xf32> to vector<16x32xf32>
    %21 = arith.mulf %18, %20 : vector<16x32xf32>
    %c0_7 = arith.constant 0 : index
    %c0_8 = arith.constant 0 : index
    %22 = vector.load %arg3[%c0_7, %c0_8] : memref<1x32xf32, #tpu.memory_space<vmem>>, vector<1x32xf32>
    %23 = vector.broadcast %22 : vector<1x32xf32> to vector<16x32xf32>
    %24 = arith.addf %21, %23 : vector<16x32xf32>
    %25 = arith.truncf %24 : vector<16x32xf32> to vector<16x32xbf16>
    %c0_9 = arith.constant 0 : index
    %c0_10 = arith.constant 0 : index
    %26 = vector.load %arg4[%c0_9, %c0_10] : memref<32x64xbf16, #tpu.memory_space<vmem>>, vector<32x64xbf16>
    %cst_11 = arith.constant dense<0.000000e+00> : vector<16x64xf32>
    %27 = tpu.matmul %25, %26, %cst_11 {dimension_numbers = #tpu.dot_dimension_numbers<[1], [0], [0], [1], [0, 0, 1, 1], [], []>} : vector<16x32xbf16>, vector<32x64xbf16>, vector<16x64xf32> -> vector<16x64xf32>
    %c0_12 = arith.constant 0 : index
    %c0_13 = arith.constant 0 : index
    %28 = vector.load %arg5[%c0_12, %c0_13] : memref<1x64xf32, #tpu.memory_space<vmem>>, vector<1x64xf32>
    %29 = vector.broadcast %28 : vector<1x64xf32> to vector<16x64xf32>
    %30 = arith.addf %27, %29 : vector<16x64xf32>
    %31 = vector.extract_strided_slice %30 {offsets = [0, 0], sizes = [16, 32], strides = [1, 1]} : vector<16x64xf32> to vector<16x32xf32>
    %32 = vector.extract_strided_slice %30 {offsets = [0, 32], sizes = [16, 32], strides = [1, 1]} : vector<16x64xf32> to vector<16x32xf32>
    %33 = arith.negf %32 : vector<16x32xf32>
    %34 = math.exp %33 : vector<16x32xf32>
    %cst_14 = arith.constant 1.000000e+00 : f32
    %35 = vector.broadcast %cst_14 : f32 to vector<16x32xf32>
    %36 = arith.addf %35, %34 : vector<16x32xf32>
    %37 = arith.divf %35, %36 : vector<16x32xf32>
    %38 = arith.mulf %31, %37 : vector<16x32xf32>
    %c0_15 = arith.constant 0 : index
    %c0_16 = arith.constant 0 : index
    %39 = vector.load %arg6[%c0_15, %c0_16] : memref<16x32xf32, #tpu.memory_space<vmem>>, vector<16x32xf32>
    tpu.vector_store %arg6[%c0_15, %c0_16], %38 {strides = array<i32>} : memref<16x32xf32, #tpu.memory_space<vmem>>, vector<16x32xf32>,
    return
  }
  func.func @transform_0(%arg0: i32) -> (i32, i32) {
    %c0_i32 = arith.constant 0 : i32
    %c0_i32_0 = arith.constant 0 : i32
    return %arg0, %c0_i32 : i32, i32
  }
  func.func @transform_1(%arg0: i32) -> (i32, i32) {
    %c0_i32 = arith.constant 0 : i32
    %c0_i32_0 = arith.constant 0 : i32
    %c0_i32_1 = arith.constant 0 : i32
    return %c0_i32, %c0_i32_0 : i32, i32
  }
  func.func @transform_2(%arg0: i32) -> (i32, i32) {
    %c0_i32 = arith.constant 0 : i32
    %c0_i32_0 = arith.constant 0 : i32
    %c0_i32_1 = arith.constant 0 : i32
    return %c0_i32, %c0_i32_0 : i32, i32
  }
  func.func @transform_3(%arg0: i32) -> (i32, i32) {
    %c0_i32 = arith.constant 0 : i32
    %c0_i32_0 = arith.constant 0 : i32
    %c0_i32_1 = arith.constant 0 : i32
    return %c0_i32, %c0_i32_0 : i32, i32
  }
  func.func @transform_4(%arg0: i32) -> (i32, i32) {
    %c0_i32 = arith.constant 0 : i32
    %c0_i32_0 = arith.constant 0 : i32
    %c0_i32_1 = arith.constant 0 : i32
    return %c0_i32, %c0_i32_0 : i32, i32
  }
  func.func @transform_5(%arg0: i32) -> (i32, i32) {
    %c0_i32 = arith.constant 0 : i32
    %c0_i32_0 = arith.constant 0 : i32
    return %arg0, %c0_i32 : i32, i32
  }
}

module attributes {stable_mosaic.version = 11 : i64} {
  func.func @_dwconv_kernel(%arg0: i32, %arg1: memref<2x38x32xf32, #tpu.memory_space<vmem>>, %arg2: memref<31x32xf32, #tpu.memory_space<vmem>>, %arg3: memref<1x32xf32, #tpu.memory_space<vmem>>, %arg4: memref<2x8x32xf32, #tpu.memory_space<vmem>>) attributes {dimension_semantics = [#tpu.dimension_semantics<arbitrary>], iteration_bounds = array<i64: 1>, scalar_prefetch = 0 : i64, scratch_operands = 0 : i64, tpu.core_type = #tpu.core_type<tc>, window_params = [{pipeline_mode = #tpu.pipeline_mode<synchronous>, transform_indices = @transform_0, window_bounds = array<i64: 2, 38, 32>}, {pipeline_mode = #tpu.pipeline_mode<synchronous>, transform_indices = @transform_1, window_bounds = array<i64: 31, 32>}, {pipeline_mode = #tpu.pipeline_mode<synchronous>, transform_indices = @transform_2, window_bounds = array<i64: 1, 32>}, {pipeline_mode = #tpu.pipeline_mode<synchronous>, transform_indices = @transform_3, window_bounds = array<i64: 2, 8, 32>}]} {
    %c0 = arith.constant 0 : index
    %c0_0 = arith.constant 0 : index
    %c0_1 = arith.constant 0 : index
    %0 = vector.load %arg1[%c0, %c0_0, %c0_1] : memref<2x38x32xf32, #tpu.memory_space<vmem>>, vector<2x38x32xf32>
    %c0_2 = arith.constant 0 : index
    %c0_3 = arith.constant 0 : index
    %1 = vector.load %arg2[%c0_2, %c0_3] : memref<31x32xf32, #tpu.memory_space<vmem>>, vector<31x32xf32>
    %2 = vector.extract_strided_slice %0 {offsets = [0, 0, 0], sizes = [2, 8, 32], strides = [1, 1, 1]} : vector<2x38x32xf32> to vector<2x8x32xf32>
    %3 = vector.extract_strided_slice %1 {offsets = [0, 0], sizes = [1, 32], strides = [1, 1]} : vector<31x32xf32> to vector<1x32xf32>
    %4 = vector.shape_cast %3 : vector<1x32xf32> to vector<1x1x32xf32>
    %5 = vector.broadcast %4 : vector<1x1x32xf32> to vector<2x8x32xf32>
    %6 = arith.mulf %2, %5 : vector<2x8x32xf32>
    %7 = vector.extract_strided_slice %0 {offsets = [0, 1, 0], sizes = [2, 8, 32], strides = [1, 1, 1]} : vector<2x38x32xf32> to vector<2x8x32xf32>
    %8 = vector.extract_strided_slice %1 {offsets = [1, 0], sizes = [1, 32], strides = [1, 1]} : vector<31x32xf32> to vector<1x32xf32>
    %9 = vector.shape_cast %8 : vector<1x32xf32> to vector<1x1x32xf32>
    %10 = vector.broadcast %9 : vector<1x1x32xf32> to vector<2x8x32xf32>
    %11 = arith.mulf %7, %10 : vector<2x8x32xf32>
    %12 = arith.addf %6, %11 : vector<2x8x32xf32>
    %13 = vector.extract_strided_slice %0 {offsets = [0, 2, 0], sizes = [2, 8, 32], strides = [1, 1, 1]} : vector<2x38x32xf32> to vector<2x8x32xf32>
    %14 = vector.extract_strided_slice %1 {offsets = [2, 0], sizes = [1, 32], strides = [1, 1]} : vector<31x32xf32> to vector<1x32xf32>
    %15 = vector.shape_cast %14 : vector<1x32xf32> to vector<1x1x32xf32>
    %16 = vector.broadcast %15 : vector<1x1x32xf32> to vector<2x8x32xf32>
    %17 = arith.mulf %13, %16 : vector<2x8x32xf32>
    %18 = arith.addf %12, %17 : vector<2x8x32xf32>
    %19 = vector.extract_strided_slice %0 {offsets = [0, 3, 0], sizes = [2, 8, 32], strides = [1, 1, 1]} : vector<2x38x32xf32> to vector<2x8x32xf32>
    %20 = vector.extract_strided_slice %1 {offsets = [3, 0], sizes = [1, 32], strides = [1, 1]} : vector<31x32xf32> to vector<1x32xf32>
    %21 = vector.shape_cast %20 : vector<1x32xf32> to vector<1x1x32xf32>
    %22 = vector.broadcast %21 : vector<1x1x32xf32> to vector<2x8x32xf32>
    %23 = arith.mulf %19, %22 : vector<2x8x32xf32>
    %24 = arith.addf %18, %23 : vector<2x8x32xf32>
    %25 = vector.extract_strided_slice %0 {offsets = [0, 4, 0], sizes = [2, 8, 32], strides = [1, 1, 1]} : vector<2x38x32xf32> to vector<2x8x32xf32>
    %26 = vector.extract_strided_slice %1 {offsets = [4, 0], sizes = [1, 32], strides = [1, 1]} : vector<31x32xf32> to vector<1x32xf32>
    %27 = vector.shape_cast %26 : vector<1x32xf32> to vector<1x1x32xf32>
    %28 = vector.broadcast %27 : vector<1x1x32xf32> to vector<2x8x32xf32>
    %29 = arith.mulf %25, %28 : vector<2x8x32xf32>
    %30 = arith.addf %24, %29 : vector<2x8x32xf32>
    %31 = vector.extract_strided_slice %0 {offsets = [0, 5, 0], sizes = [2, 8, 32], strides = [1, 1, 1]} : vector<2x38x32xf32> to vector<2x8x32xf32>
    %32 = vector.extract_strided_slice %1 {offsets = [5, 0], sizes = [1, 32], strides = [1, 1]} : vector<31x32xf32> to vector<1x32xf32>
    %33 = vector.shape_cast %32 : vector<1x32xf32> to vector<1x1x32xf32>
    %34 = vector.broadcast %33 : vector<1x1x32xf32> to vector<2x8x32xf32>
    %35 = arith.mulf %31, %34 : vector<2x8x32xf32>
    %36 = arith.addf %30, %35 : vector<2x8x32xf32>
    %37 = vector.extract_strided_slice %0 {offsets = [0, 6, 0], sizes = [2, 8, 32], strides = [1, 1, 1]} : vector<2x38x32xf32> to vector<2x8x32xf32>
    %38 = vector.extract_strided_slice %1 {offsets = [6, 0], sizes = [1, 32], strides = [1, 1]} : vector<31x32xf32> to vector<1x32xf32>
    %39 = vector.shape_cast %38 : vector<1x32xf32> to vector<1x1x32xf32>
    %40 = vector.broadcast %39 : vector<1x1x32xf32> to vector<2x8x32xf32>
    %41 = arith.mulf %37, %40 : vector<2x8x32xf32>
    %42 = arith.addf %36, %41 : vector<2x8x32xf32>
    %43 = vector.extract_strided_slice %0 {offsets = [0, 7, 0], sizes = [2, 8, 32], strides = [1, 1, 1]} : vector<2x38x32xf32> to vector<2x8x32xf32>
    %44 = vector.extract_strided_slice %1 {offsets = [7, 0], sizes = [1, 32], strides = [1, 1]} : vector<31x32xf32> to vector<1x32xf32>
    %45 = vector.shape_cast %44 : vector<1x32xf32> to vector<1x1x32xf32>
    %46 = vector.broadcast %45 : vector<1x1x32xf32> to vector<2x8x32xf32>
    %47 = arith.mulf %43, %46 : vector<2x8x32xf32>
    %48 = arith.addf %42, %47 : vector<2x8x32xf32>
    %49 = vector.extract_strided_slice %0 {offsets = [0, 8, 0], sizes = [2, 8, 32], strides = [1, 1, 1]} : vector<2x38x32xf32> to vector<2x8x32xf32>
    %50 = vector.extract_strided_slice %1 {offsets = [8, 0], sizes = [1, 32], strides = [1, 1]} : vector<31x32xf32> to vector<1x32xf32>
    %51 = vector.shape_cast %50 : vector<1x32xf32> to vector<1x1x32xf32>
    %52 = vector.broadcast %51 : vector<1x1x32xf32> to vector<2x8x32xf32>
    %53 = arith.mulf %49, %52 : vector<2x8x32xf32>
    %54 = arith.addf %48, %53 : vector<2x8x32xf32>
    %55 = vector.extract_strided_slice %0 {offsets = [0, 9, 0], sizes = [2, 8, 32], strides = [1, 1, 1]} : vector<2x38x32xf32> to vector<2x8x32xf32>
    %56 = vector.extract_strided_slice %1 {offsets = [9, 0], sizes = [1, 32], strides = [1, 1]} : vector<31x32xf32> to vector<1x32xf32>
    %57 = vector.shape_cast %56 : vector<1x32xf32> to vector<1x1x32xf32>
    %58 = vector.broadcast %57 : vector<1x1x32xf32> to vector<2x8x32xf32>
    %59 = arith.mulf %55, %58 : vector<2x8x32xf32>
    %60 = arith.addf %54, %59 : vector<2x8x32xf32>
    %61 = vector.extract_strided_slice %0 {offsets = [0, 10, 0], sizes = [2, 8, 32], strides = [1, 1, 1]} : vector<2x38x32xf32> to vector<2x8x32xf32>
    %62 = vector.extract_strided_slice %1 {offsets = [10, 0], sizes = [1, 32], strides = [1, 1]} : vector<31x32xf32> to vector<1x32xf32>
    %63 = vector.shape_cast %62 : vector<1x32xf32> to vector<1x1x32xf32>
    %64 = vector.broadcast %63 : vector<1x1x32xf32> to vector<2x8x32xf32>
    %65 = arith.mulf %61, %64 : vector<2x8x32xf32>
    %66 = arith.addf %60, %65 : vector<2x8x32xf32>
    %67 = vector.extract_strided_slice %0 {offsets = [0, 11, 0], sizes = [2, 8, 32], strides = [1, 1, 1]} : vector<2x38x32xf32> to vector<2x8x32xf32>
    %68 = vector.extract_strided_slice %1 {offsets = [11, 0], sizes = [1, 32], strides = [1, 1]} : vector<31x32xf32> to vector<1x32xf32>
    %69 = vector.shape_cast %68 : vector<1x32xf32> to vector<1x1x32xf32>
    %70 = vector.broadcast %69 : vector<1x1x32xf32> to vector<2x8x32xf32>
    %71 = arith.mulf %67, %70 : vector<2x8x32xf32>
    %72 = arith.addf %66, %71 : vector<2x8x32xf32>
    %73 = vector.extract_strided_slice %0 {offsets = [0, 12, 0], sizes = [2, 8, 32], strides = [1, 1, 1]} : vector<2x38x32xf32> to vector<2x8x32xf32>
    %74 = vector.extract_strided_slice %1 {offsets = [12, 0], sizes = [1, 32], strides = [1, 1]} : vector<31x32xf32> to vector<1x32xf32>
    %75 = vector.shape_cast %74 : vector<1x32xf32> to vector<1x1x32xf32>
    %76 = vector.broadcast %75 : vector<1x1x32xf32> to vector<2x8x32xf32>
    %77 = arith.mulf %73, %76 : vector<2x8x32xf32>
    %78 = arith.addf %72, %77 : vector<2x8x32xf32>
    %79 = vector.extract_strided_slice %0 {offsets = [0, 13, 0], sizes = [2, 8, 32], strides = [1, 1, 1]} : vector<2x38x32xf32> to vector<2x8x32xf32>
    %80 = vector.extract_strided_slice %1 {offsets = [13, 0], sizes = [1, 32], strides = [1, 1]} : vector<31x32xf32> to vector<1x32xf32>
    %81 = vector.shape_cast %80 : vector<1x32xf32> to vector<1x1x32xf32>
    %82 = vector.broadcast %81 : vector<1x1x32xf32> to vector<2x8x32xf32>
    %83 = arith.mulf %79, %82 : vector<2x8x32xf32>
    %84 = arith.addf %78, %83 : vector<2x8x32xf32>
    %85 = vector.extract_strided_slice %0 {offsets = [0, 14, 0], sizes = [2, 8, 32], strides = [1, 1, 1]} : vector<2x38x32xf32> to vector<2x8x32xf32>
    %86 = vector.extract_strided_slice %1 {offsets = [14, 0], sizes = [1, 32], strides = [1, 1]} : vector<31x32xf32> to vector<1x32xf32>
    %87 = vector.shape_cast %86 : vector<1x32xf32> to vector<1x1x32xf32>
    %88 = vector.broadcast %87 : vector<1x1x32xf32> to vector<2x8x32xf32>
    %89 = arith.mulf %85, %88 : vector<2x8x32xf32>
    %90 = arith.addf %84, %89 : vector<2x8x32xf32>
    %91 = vector.extract_strided_slice %0 {offsets = [0, 15, 0], sizes = [2, 8, 32], strides = [1, 1, 1]} : vector<2x38x32xf32> to vector<2x8x32xf32>
    %92 = vector.extract_strided_slice %1 {offsets = [15, 0], sizes = [1, 32], strides = [1, 1]} : vector<31x32xf32> to vector<1x32xf32>
    %93 = vector.shape_cast %92 : vector<1x32xf32> to vector<1x1x32xf32>
    %94 = vector.broadcast %93 : vector<1x1x32xf32> to vector<2x8x32xf32>
    %95 = arith.mulf %91, %94 : vector<2x8x32xf32>
    %96 = arith.addf %90, %95 : vector<2x8x32xf32>
    %97 = vector.extract_strided_slice %0 {offsets = [0, 16, 0], sizes = [2, 8, 32], strides = [1, 1, 1]} : vector<2x38x32xf32> to vector<2x8x32xf32>
    %98 = vector.extract_strided_slice %1 {offsets = [16, 0], sizes = [1, 32], strides = [1, 1]} : vector<31x32xf32> to vector<1x32xf32>
    %99 = vector.shape_cast %98 : vector<1x32xf32> to vector<1x1x32xf32>
    %100 = vector.broadcast %99 : vector<1x1x32xf32> to vector<2x8x32xf32>
    %101 = arith.mulf %97, %100 : vector<2x8x32xf32>
    %102 = arith.addf %96, %101 : vector<2x8x32xf32>
    %103 = vector.extract_strided_slice %0 {offsets = [0, 17, 0], sizes = [2, 8, 32], strides = [1, 1, 1]} : vector<2x38x32xf32> to vector<2x8x32xf32>
    %104 = vector.extract_strided_slice %1 {offsets = [17, 0], sizes = [1, 32], strides = [1, 1]} : vector<31x32xf32> to vector<1x32xf32>
    %105 = vector.shape_cast %104 : vector<1x32xf32> to vector<1x1x32xf32>
    %106 = vector.broadcast %105 : vector<1x1x32xf32> to vector<2x8x32xf32>
    %107 = arith.mulf %103, %106 : vector<2x8x32xf32>
    %108 = arith.addf %102, %107 : vector<2x8x32xf32>
    %109 = vector.extract_strided_slice %0 {offsets = [0, 18, 0], sizes = [2, 8, 32], strides = [1, 1, 1]} : vector<2x38x32xf32> to vector<2x8x32xf32>
    %110 = vector.extract_strided_slice %1 {offsets = [18, 0], sizes = [1, 32], strides = [1, 1]} : vector<31x32xf32> to vector<1x32xf32>
    %111 = vector.shape_cast %110 : vector<1x32xf32> to vector<1x1x32xf32>
    %112 = vector.broadcast %111 : vector<1x1x32xf32> to vector<2x8x32xf32>
    %113 = arith.mulf %109, %112 : vector<2x8x32xf32>
    %114 = arith.addf %108, %113 : vector<2x8x32xf32>
    %115 = vector.extract_strided_slice %0 {offsets = [0, 19, 0], sizes = [2, 8, 32], strides = [1, 1, 1]} : vector<2x38x32xf32> to vector<2x8x32xf32>
    %116 = vector.extract_strided_slice %1 {offsets = [19, 0], sizes = [1, 32], strides = [1, 1]} : vector<31x32xf32> to vector<1x32xf32>
    %117 = vector.shape_cast %116 : vector<1x32xf32> to vector<1x1x32xf32>
    %118 = vector.broadcast %117 : vector<1x1x32xf32> to vector<2x8x32xf32>
    %119 = arith.mulf %115, %118 : vector<2x8x32xf32>
    %120 = arith.addf %114, %119 : vector<2x8x32xf32>
    %121 = vector.extract_strided_slice %0 {offsets = [0, 20, 0], sizes = [2, 8, 32], strides = [1, 1, 1]} : vector<2x38x32xf32> to vector<2x8x32xf32>
    %122 = vector.extract_strided_slice %1 {offsets = [20, 0], sizes = [1, 32], strides = [1, 1]} : vector<31x32xf32> to vector<1x32xf32>
    %123 = vector.shape_cast %122 : vector<1x32xf32> to vector<1x1x32xf32>
    %124 = vector.broadcast %123 : vector<1x1x32xf32> to vector<2x8x32xf32>
    %125 = arith.mulf %121, %124 : vector<2x8x32xf32>
    %126 = arith.addf %120, %125 : vector<2x8x32xf32>
    %127 = vector.extract_strided_slice %0 {offsets = [0, 21, 0], sizes = [2, 8, 32], strides = [1, 1, 1]} : vector<2x38x32xf32> to vector<2x8x32xf32>
    %128 = vector.extract_strided_slice %1 {offsets = [21, 0], sizes = [1, 32], strides = [1, 1]} : vector<31x32xf32> to vector<1x32xf32>
    %129 = vector.shape_cast %128 : vector<1x32xf32> to vector<1x1x32xf32>
    %130 = vector.broadcast %129 : vector<1x1x32xf32> to vector<2x8x32xf32>
    %131 = arith.mulf %127, %130 : vector<2x8x32xf32>
    %132 = arith.addf %126, %131 : vector<2x8x32xf32>
    %133 = vector.extract_strided_slice %0 {offsets = [0, 22, 0], sizes = [2, 8, 32], strides = [1, 1, 1]} : vector<2x38x32xf32> to vector<2x8x32xf32>
    %134 = vector.extract_strided_slice %1 {offsets = [22, 0], sizes = [1, 32], strides = [1, 1]} : vector<31x32xf32> to vector<1x32xf32>
    %135 = vector.shape_cast %134 : vector<1x32xf32> to vector<1x1x32xf32>
    %136 = vector.broadcast %135 : vector<1x1x32xf32> to vector<2x8x32xf32>
    %137 = arith.mulf %133, %136 : vector<2x8x32xf32>
    %138 = arith.addf %132, %137 : vector<2x8x32xf32>
    %139 = vector.extract_strided_slice %0 {offsets = [0, 23, 0], sizes = [2, 8, 32], strides = [1, 1, 1]} : vector<2x38x32xf32> to vector<2x8x32xf32>
    %140 = vector.extract_strided_slice %1 {offsets = [23, 0], sizes = [1, 32], strides = [1, 1]} : vector<31x32xf32> to vector<1x32xf32>
    %141 = vector.shape_cast %140 : vector<1x32xf32> to vector<1x1x32xf32>
    %142 = vector.broadcast %141 : vector<1x1x32xf32> to vector<2x8x32xf32>
    %143 = arith.mulf %139, %142 : vector<2x8x32xf32>
    %144 = arith.addf %138, %143 : vector<2x8x32xf32>
    %145 = vector.extract_strided_slice %0 {offsets = [0, 24, 0], sizes = [2, 8, 32], strides = [1, 1, 1]} : vector<2x38x32xf32> to vector<2x8x32xf32>
    %146 = vector.extract_strided_slice %1 {offsets = [24, 0], sizes = [1, 32], strides = [1, 1]} : vector<31x32xf32> to vector<1x32xf32>
    %147 = vector.shape_cast %146 : vector<1x32xf32> to vector<1x1x32xf32>
    %148 = vector.broadcast %147 : vector<1x1x32xf32> to vector<2x8x32xf32>
    %149 = arith.mulf %145, %148 : vector<2x8x32xf32>
    %150 = arith.addf %144, %149 : vector<2x8x32xf32>
    %151 = vector.extract_strided_slice %0 {offsets = [0, 25, 0], sizes = [2, 8, 32], strides = [1, 1, 1]} : vector<2x38x32xf32> to vector<2x8x32xf32>
    %152 = vector.extract_strided_slice %1 {offsets = [25, 0], sizes = [1, 32], strides = [1, 1]} : vector<31x32xf32> to vector<1x32xf32>
    %153 = vector.shape_cast %152 : vector<1x32xf32> to vector<1x1x32xf32>
    %154 = vector.broadcast %153 : vector<1x1x32xf32> to vector<2x8x32xf32>
    %155 = arith.mulf %151, %154 : vector<2x8x32xf32>
    %156 = arith.addf %150, %155 : vector<2x8x32xf32>
    %157 = vector.extract_strided_slice %0 {offsets = [0, 26, 0], sizes = [2, 8, 32], strides = [1, 1, 1]} : vector<2x38x32xf32> to vector<2x8x32xf32>
    %158 = vector.extract_strided_slice %1 {offsets = [26, 0], sizes = [1, 32], strides = [1, 1]} : vector<31x32xf32> to vector<1x32xf32>
    %159 = vector.shape_cast %158 : vector<1x32xf32> to vector<1x1x32xf32>
    %160 = vector.broadcast %159 : vector<1x1x32xf32> to vector<2x8x32xf32>
    %161 = arith.mulf %157, %160 : vector<2x8x32xf32>
    %162 = arith.addf %156, %161 : vector<2x8x32xf32>
    %163 = vector.extract_strided_slice %0 {offsets = [0, 27, 0], sizes = [2, 8, 32], strides = [1, 1, 1]} : vector<2x38x32xf32> to vector<2x8x32xf32>
    %164 = vector.extract_strided_slice %1 {offsets = [27, 0], sizes = [1, 32], strides = [1, 1]} : vector<31x32xf32> to vector<1x32xf32>
    %165 = vector.shape_cast %164 : vector<1x32xf32> to vector<1x1x32xf32>
    %166 = vector.broadcast %165 : vector<1x1x32xf32> to vector<2x8x32xf32>
    %167 = arith.mulf %163, %166 : vector<2x8x32xf32>
    %168 = arith.addf %162, %167 : vector<2x8x32xf32>
    %169 = vector.extract_strided_slice %0 {offsets = [0, 28, 0], sizes = [2, 8, 32], strides = [1, 1, 1]} : vector<2x38x32xf32> to vector<2x8x32xf32>
    %170 = vector.extract_strided_slice %1 {offsets = [28, 0], sizes = [1, 32], strides = [1, 1]} : vector<31x32xf32> to vector<1x32xf32>
    %171 = vector.shape_cast %170 : vector<1x32xf32> to vector<1x1x32xf32>
    %172 = vector.broadcast %171 : vector<1x1x32xf32> to vector<2x8x32xf32>
    %173 = arith.mulf %169, %172 : vector<2x8x32xf32>
    %174 = arith.addf %168, %173 : vector<2x8x32xf32>
    %175 = vector.extract_strided_slice %0 {offsets = [0, 29, 0], sizes = [2, 8, 32], strides = [1, 1, 1]} : vector<2x38x32xf32> to vector<2x8x32xf32>
    %176 = vector.extract_strided_slice %1 {offsets = [29, 0], sizes = [1, 32], strides = [1, 1]} : vector<31x32xf32> to vector<1x32xf32>
    %177 = vector.shape_cast %176 : vector<1x32xf32> to vector<1x1x32xf32>
    %178 = vector.broadcast %177 : vector<1x1x32xf32> to vector<2x8x32xf32>
    %179 = arith.mulf %175, %178 : vector<2x8x32xf32>
    %180 = arith.addf %174, %179 : vector<2x8x32xf32>
    %181 = vector.extract_strided_slice %0 {offsets = [0, 30, 0], sizes = [2, 8, 32], strides = [1, 1, 1]} : vector<2x38x32xf32> to vector<2x8x32xf32>
    %182 = vector.extract_strided_slice %1 {offsets = [30, 0], sizes = [1, 32], strides = [1, 1]} : vector<31x32xf32> to vector<1x32xf32>
    %183 = vector.shape_cast %182 : vector<1x32xf32> to vector<1x1x32xf32>
    %184 = vector.broadcast %183 : vector<1x1x32xf32> to vector<2x8x32xf32>
    %185 = arith.mulf %181, %184 : vector<2x8x32xf32>
    %186 = arith.addf %180, %185 : vector<2x8x32xf32>
    %c0_4 = arith.constant 0 : index
    %c0_5 = arith.constant 0 : index
    %187 = vector.load %arg3[%c0_4, %c0_5] : memref<1x32xf32, #tpu.memory_space<vmem>>, vector<1x32xf32>
    %188 = vector.shape_cast %187 : vector<1x32xf32> to vector<1x1x32xf32>
    %189 = vector.broadcast %188 : vector<1x1x32xf32> to vector<2x8x32xf32>
    %190 = arith.addf %186, %189 : vector<2x8x32xf32>
    %191 = arith.negf %190 : vector<2x8x32xf32>
    %192 = math.exp %191 : vector<2x8x32xf32>
    %cst = arith.constant 1.000000e+00 : f32
    %193 = vector.broadcast %cst : f32 to vector<2x8x32xf32>
    %194 = arith.addf %193, %192 : vector<2x8x32xf32>
    %195 = arith.divf %193, %194 : vector<2x8x32xf32>
    %196 = arith.mulf %190, %195 : vector<2x8x32xf32>
    %c0_6 = arith.constant 0 : index
    %c0_7 = arith.constant 0 : index
    %c0_8 = arith.constant 0 : index
    %197 = vector.load %arg4[%c0_6, %c0_7, %c0_8] : memref<2x8x32xf32, #tpu.memory_space<vmem>>, vector<2x8x32xf32>
    tpu.vector_store %arg4[%c0_6, %c0_7, %c0_8], %196 {strides = array<i32>} : memref<2x8x32xf32, #tpu.memory_space<vmem>>, vector<2x8x32xf32>,
    return
  }
  func.func @transform_0(%arg0: i32) -> (i32, i32, i32) {
    %c0_i32 = arith.constant 0 : i32
    %c0_i32_0 = arith.constant 0 : i32
    %c0_i32_1 = arith.constant 0 : i32
    %c0_i32_2 = arith.constant 0 : i32
    return %c0_i32, %c0_i32_0, %c0_i32_1 : i32, i32, i32
  }
  func.func @transform_1(%arg0: i32) -> (i32, i32) {
    %c0_i32 = arith.constant 0 : i32
    %c0_i32_0 = arith.constant 0 : i32
    %c0_i32_1 = arith.constant 0 : i32
    return %c0_i32, %c0_i32_0 : i32, i32
  }
  func.func @transform_2(%arg0: i32) -> (i32, i32) {
    %c0_i32 = arith.constant 0 : i32
    %c0_i32_0 = arith.constant 0 : i32
    %c0_i32_1 = arith.constant 0 : i32
    return %c0_i32, %c0_i32_0 : i32, i32
  }
  func.func @transform_3(%arg0: i32) -> (i32, i32, i32) {
    %c0_i32 = arith.constant 0 : i32
    %c0_i32_0 = arith.constant 0 : i32
    %c0_i32_1 = arith.constant 0 : i32
    %c0_i32_2 = arith.constant 0 : i32
    return %c0_i32, %c0_i32_0, %c0_i32_1 : i32, i32, i32
  }
}

module attributes {stable_mosaic.version = 11 : i64} {
  func.func @_layernorm_kernel(%arg0: i32, %arg1: memref<16x32xf32, #tpu.memory_space<vmem>>, %arg2: memref<1x32xf32, #tpu.memory_space<vmem>>, %arg3: memref<1x32xf32, #tpu.memory_space<vmem>>, %arg4: memref<16x32xf32, #tpu.memory_space<vmem>>) attributes {dimension_semantics = [#tpu.dimension_semantics<parallel>], iteration_bounds = array<i64: 1>, scalar_prefetch = 0 : i64, scratch_operands = 0 : i64, tpu.core_type = #tpu.core_type<tc>, window_params = [{transform_indices = @transform_0, window_bounds = array<i64: 16, 32>}, {pipeline_mode = #tpu.pipeline_mode<synchronous>, transform_indices = @transform_1, window_bounds = array<i64: 1, 32>}, {pipeline_mode = #tpu.pipeline_mode<synchronous>, transform_indices = @transform_2, window_bounds = array<i64: 1, 32>}, {transform_indices = @transform_3, window_bounds = array<i64: 16, 32>}]} {
    %c0 = arith.constant 0 : index
    %c0_0 = arith.constant 0 : index
    %0 = vector.load %arg1[%c0, %c0_0] : memref<16x32xf32, #tpu.memory_space<vmem>>, vector<16x32xf32>
    %cst = arith.constant dense<0.000000e+00> : vector<16xf32>
    %1 = vector.multi_reduction <add>, %0, %cst [1] : vector<16x32xf32> to vector<16xf32>
    %2 = vector.shape_cast %1 : vector<16xf32> to vector<16x1xf32>
    %cst_1 = arith.constant 3.200000e+01 : f32
    %3 = vector.broadcast %cst_1 : f32 to vector<16x1xf32>
    %4 = arith.divf %2, %3 : vector<16x1xf32>
    %5 = vector.broadcast %4 : vector<16x1xf32> to vector<16x32xf32>
    %6 = arith.subf %0, %5 : vector<16x32xf32>
    %7 = arith.mulf %6, %6 : vector<16x32xf32>
    %cst_2 = arith.constant dense<0.000000e+00> : vector<16xf32>
    %8 = vector.multi_reduction <add>, %7, %cst_2 [1] : vector<16x32xf32> to vector<16xf32>
    %9 = vector.shape_cast %8 : vector<16xf32> to vector<16x1xf32>
    %cst_3 = arith.constant 3.200000e+01 : f32
    %10 = vector.broadcast %cst_3 : f32 to vector<16x1xf32>
    %11 = arith.divf %9, %10 : vector<16x1xf32>
    %12 = vector.broadcast %4 : vector<16x1xf32> to vector<16x32xf32>
    %13 = arith.subf %0, %12 : vector<16x32xf32>
    %cst_4 = arith.constant 9.99999974E-6 : f32
    %14 = vector.broadcast %cst_4 : f32 to vector<16x1xf32>
    %15 = arith.addf %11, %14 : vector<16x1xf32>
    %16 = math.rsqrt %15 : vector<16x1xf32>
    %17 = vector.broadcast %16 : vector<16x1xf32> to vector<16x32xf32>
    %18 = arith.mulf %13, %17 : vector<16x32xf32>
    %c0_5 = arith.constant 0 : index
    %c0_6 = arith.constant 0 : index
    %19 = vector.load %arg2[%c0_5, %c0_6] : memref<1x32xf32, #tpu.memory_space<vmem>>, vector<1x32xf32>
    %20 = vector.broadcast %19 : vector<1x32xf32> to vector<16x32xf32>
    %21 = arith.mulf %18, %20 : vector<16x32xf32>
    %c0_7 = arith.constant 0 : index
    %c0_8 = arith.constant 0 : index
    %22 = vector.load %arg3[%c0_7, %c0_8] : memref<1x32xf32, #tpu.memory_space<vmem>>, vector<1x32xf32>
    %23 = vector.broadcast %22 : vector<1x32xf32> to vector<16x32xf32>
    %24 = arith.addf %21, %23 : vector<16x32xf32>
    %c0_9 = arith.constant 0 : index
    %c0_10 = arith.constant 0 : index
    %25 = vector.load %arg4[%c0_9, %c0_10] : memref<16x32xf32, #tpu.memory_space<vmem>>, vector<16x32xf32>
    tpu.vector_store %arg4[%c0_9, %c0_10], %24 {strides = array<i32>} : memref<16x32xf32, #tpu.memory_space<vmem>>, vector<16x32xf32>,
    return
  }
  func.func @transform_0(%arg0: i32) -> (i32, i32) {
    %c0_i32 = arith.constant 0 : i32
    %c0_i32_0 = arith.constant 0 : i32
    return %arg0, %c0_i32 : i32, i32
  }
  func.func @transform_1(%arg0: i32) -> (i32, i32) {
    %c0_i32 = arith.constant 0 : i32
    %c0_i32_0 = arith.constant 0 : i32
    %c0_i32_1 = arith.constant 0 : i32
    return %c0_i32, %c0_i32_0 : i32, i32
  }
  func.func @transform_2(%arg0: i32) -> (i32, i32) {
    %c0_i32 = arith.constant 0 : i32
    %c0_i32_0 = arith.constant 0 : i32
    %c0_i32_1 = arith.constant 0 : i32
    return %c0_i32, %c0_i32_0 : i32, i32
  }
  func.func @transform_3(%arg0: i32) -> (i32, i32) {
    %c0_i32 = arith.constant 0 : i32
    %c0_i32_0 = arith.constant 0 : i32
    return %arg0, %c0_i32 : i32, i32
  }
}

</mosaic_0001>

<bundles_post_ra>
// kernel: _lambda_.21
= control target key start
LH: loop header
LB: loop body
LE: loop exit
PB: predicated region body
PF: predicated region fallthrough
CT: control target
= control target key end

     0   :  { %vm23_vm0 = vcmask 261120   ;;  %v153_v4 = vmov 32.0   ;;  %vm125_vm8 = vcmask 785408   ;;  %s216_s0 = inlined_call_operand.vmem [shape: f32[16,32], index: 0, kind: input, shape index: {}]   ;;  %s217_s1 = inlined_call_operand.vmem [shape: f32[1,32], index: 1, kind: input, shape index: {}]   ;;  %s218_s2 = inlined_call_operand.vmem [shape: f32[1,32], index: 2, kind: input, shape index: {}]   ;;  %s219_s4 = inlined_call_operand.vmem [shape: f32[1,96], index: 4, kind: input, shape index: {}]   ;;  %s220_s3 = inlined_call_operand.vmem [shape: bf16[32,96], index: 3, kind: input, shape index: {}]   ;;  %s221_s5 = inlined_call_operand.vmem [shape: f32[16,96], index: 5, kind: output, shape index: {}]  }
   0x1   :  { %v21_v0 = vld [vmem:[%s216_s0] sm:$0xff]  ;;  %v22_v2 = vld [vmem:[%s216_s0 + $0x8] sm:$0xff]  ;;  %147 = vrcp.f32 %v153_v4 }
   0x2   :  { %v24_v1 = vsel %vm23_vm0, %v21_v0, 0.0  ;;  %v27_v3 = vsel %vm23_vm0, %v22_v2, 0.0  ;;  %v142_v21 = vld [vmem:[%s220_s3 + $0x8] sm:$0xff]  ;;  %v141_v23 = vld [vmem:[%s220_s3] sm:$0xff] }
   0x3   :  { %25 = vadd.xlane.f32.xlu0 %v24_v1  ;;  %117 = vmatpush.bf16.msra.mxu0 %v142_v21  ;;  %v144_v42 = vld [vmem:[%s217_s1] ss:$0 sm:$0xff] }
   0x4   :  { %v145_v47 = vld [vmem:[%s218_s2] ss:$0 sm:$0xff] }
   0x5   :  { %v146_v52 = vld [vmem:[%s219_s4] ss:$0 sm:$0xff] }
   0x7   :  { %v148_v5 = vpop.eup %147  ;;  %118 = vmatpush.bf16.msra.mxu0 %v141_v23 }
   0x8   :  { %v31_v6 = vmul.f32 32.0, %v148_v5  ;;  %vm35_vm1 = vweird.f32 %v148_v5 }
   0xa   :  { %v32_v7 = vsub.f32 1.0, %v31_v6 }
   0xb   :  { %28 = vadd.xlane.f32.xlu0 %v27_v3 }
   0xc   :  { %v33_v8 = vmul.f32 %v148_v5, %v32_v7 }
   0xe   :  { %v34_v9 = vadd.f32 %v148_v5, %v33_v8 }
  0x10   :  { %v36_v10 = vsel %vm35_vm1, %v148_v5, %v34_v9 }
  0x76   :  { %v26_v11 = vpop.xlane.xlu0 %25 }
  0x77   :  { %v37_v12 = vmul.f32 %v36_v10, %v26_v11 }
  0x79   :  { %v39_v13 = vsub.f32 %v21_v0, %v37_v12 }
  0x7b   :  { %v41_v14 = vmul.f32 %v39_v13, %v39_v13 }
  0x7d   :  { %v43_v15 = vsel %vm23_vm0, %v41_v14, 0.0 }
  0x7e   :  { %44 = vadd.xlane.f32.xlu1 %v43_v15  ;;  %v29_v16 = vpop.xlane.xlu0 %28 }
  0x7f   :  { %v38_v17 = vmul.f32 %v36_v10, %v29_v16 }
  0x81   :  { %v40_v18 = vsub.f32 %v22_v2, %v38_v17 }
  0x83   :  { %v42_v19 = vmul.f32 %v40_v18, %v40_v18 }
  0x85   :  { %v46_v20 = vsel %vm23_vm0, %v42_v19, 0.0 }
  0x86   :  { %47 = vadd.xlane.f32.xlu1 %v46_v20 }
  0xf1   :  { %v45_v22 = vpop.xlane.xlu1 %44 }
  0xf2   :  { %v49_v24 = vmul.f32 %v45_v22, %v36_v10 }
  0xf4   :  { %v51_v25 = vadd.f32 1e-05, %v49_v24 }
  0xf6   :  { %149 = vrsqrt.f32 %v51_v25  ;;  %vm59_vm3 = vweird.f32 %v51_v25 }
  0xf9   :  { %v48_v26 = vpop.xlane.xlu1 %47 }
  0xfa   :  { %v50_v27 = vmul.f32 %v48_v26, %v36_v10 }
  0xfc   :  { %v150_v28 = vpop.eup %149  ;;  %v52_v29 = vadd.f32 1e-05, %v50_v27 }
  0xfd   :  { %v54_v30 = vmul.f32 %v150_v28, %v51_v25  ;;  %vm60_vm2 = vweird.f32 %v150_v28 }
  0xfe   :  { %151 = vrsqrt.f32 %v52_v29  ;;  %vm61_vm4 = vmor %vm59_vm3, %vm60_vm2  ;;  %vm69_vm6 = vweird.f32 %v52_v29 }
  0xff   :  { %v55_v31 = vmul.f32 %v150_v28, %v54_v30 }
 0x101   :  { %v56_v32 = vmul.f32 0.5, %v55_v31 }
 0x103   :  { %v57_v33 = vsub.f32 1.5, %v56_v32 }
 0x104   :  { %v152_v34 = vpop.eup %151 }
 0x105   :  { %v58_v35 = vmul.f32 %v150_v28, %v57_v33  ;;  %v64_v36 = vmul.f32 %v152_v34, %v52_v29  ;;  %vm70_vm5 = vweird.f32 %v152_v34 }
 0x106   :  { %vm71_vm7 = vmor %vm69_vm6, %vm70_vm5 }
 0x107   :  { %v65_v37 = vmul.f32 %v152_v34, %v64_v36  ;;  %v62_v38 = vsel %vm61_vm4, %v150_v28, %v58_v35 }
 0x108   :  { %v73_v41 = vmul.f32 %v62_v38, %v39_v13 }
 0x109   :  { %v66_v39 = vmul.f32 0.5, %v65_v37 }
 0x10a   :  { %v79_v46 = vmul.f32 %v144_v42, %v73_v41 }
 0x10b   :  { %v67_v40 = vsub.f32 1.5, %v66_v39 }
 0x10c   :  { %v85_v49 = vadd.f32 %v145_v47, %v79_v46 }
 0x10d   :  { %v68_v43 = vmul.f32 %v152_v34, %v67_v40 }
 0x10f   :  { %v72_v44 = vsel %vm71_vm7, %v152_v34, %v68_v43 }
 0x110   :  { %v74_v45 = vmul.f32 %v72_v44, %v40_v18 }
 0x112   :  { %v80_v48 = vmul.f32 %v144_v42, %v74_v45 }
 0x114   :  { %v86_v50 = vadd.f32 %v145_v47, %v80_v48 }
 0x116   :  { %v87_v51 = vpack.c.bf16 %v86_v50, %v85_v49 }
 0x118   :  { %140 = vmatmul.msk.bf16.vlgmr.msra.gmra.mxu0 %vm23_vm0, %v87_v51 }
 0x195   :  { %v120_v53 = vpop.f32.mrf.mxu0 }
 0x196   :  { %v121_v54 = vadd.f32 %v146_v52, %v120_v53 }
 0x198   :  { %126 = vst.msk [vmem:[%s221_s5] sm:$0xff] %vm125_vm8, %v121_v54 }
 0x19d   :  { %v122_v55 = vpop.f32.mrf.mxu0 }
 0x19e   :  { %v123_v56 = vadd.f32 %v146_v52, %v122_v55 }
 0x1a0   :  { %127 = vst.msk [vmem:[%s221_s5 + $0x8] sm:$0xff] %vm125_vm8, %v123_v56 }

// kernel: _lambda_.19
= control target key start
LH: loop header
LB: loop body
LE: loop exit
PB: predicated region body
PF: predicated region fallthrough
CT: control target
= control target key end

     0   :  { %vm36_vm0 = vcmask 1043456   ;;  %vm19_vm1 = vcmask 261120   ;;  %v84_v1 = vmov 0.0   ;;  %vm32_vm2 = vcmask 64512   ;;  %s150_s1 = inlined_call_operand.vmem [shape: bf16[8,32], index: 1, kind: input, shape index: {}]   ;;  %s151_s0 = inlined_call_operand.vmem [shape: bf16[16,8], index: 0, kind: input, shape index: {}]   ;;  %s152_s2 = inlined_call_operand.vmem [shape: f32[1,32], index: 2, kind: input, shape index: {}]   ;;  %s153_s3 = inlined_call_operand.vmem [shape: f32[16,32], index: 3, kind: output, shape index: {}]  }
   0x1   :  { %v26_v0 = vld [vmem:[%s150_s1] sm:$0xf]  ;;  %20 = vst.msk [vmem:[%s153_s3] sm:$0xff] %vm19_vm1, %v84_v1 }
   0x2   :  { %v38_v2 = vsel %vm36_vm0, %v26_v0, 0  ;;  %v81_v3 = vld [vmem:[%s151_s0] sm:$0xff]  ;;  %21 = vst.msk [vmem:[%s153_s3 + $0x8] sm:$0xff] %vm19_vm1, %v84_v1 }
   0x3   :  { %47 = vmatpush.bf16.msra.mxu0 %v38_v2  ;;  %v83_v8 = vld [vmem:[%s152_s2] ss:$0 sm:$0xff] }
   0x6   :  { %80 = vmatmul.msk.bf16.vlgmr.msra.gmra.mxu0 %vm32_vm2, %v81_v3 }
   0x8   :  { %v22_v4 = vld [vmem:[%s153_s3] sm:$0xff] }
   0x9   :  { %v23_v7 = vld [vmem:[%s153_s3 + $0x8] sm:$0xff] }
  0x83   :  { %v49_v5 = vpop.f32.mrf.mxu0 }
  0x84   :  { %v54_v6 = vadd.f32 %v49_v5, %v22_v4 }
  0x86   :  { %57 = vst.msk [vmem:[%s153_s3] sm:$0xff] %vm19_vm1, %v54_v6 }
  0x8b   :  { %v51_v9 = vpop.f32.mrf.mxu0 }
  0x8c   :  { %v55_v10 = vadd.f32 %v51_v9, %v23_v7 }
  0x8d   :  { %v62_v11 = vld [vmem:[%s153_s3] sm:$0xff] }
  0x8e   :  { %v68_v12 = vadd.f32 %v83_v8, %v62_v11  ;;  %58 = vst.msk [vmem:[%s153_s3 + $0x8] sm:$0xff] %vm19_vm1, %v55_v10 }
  0x90   :  { %70 = vst.msk [vmem:[%s153_s3] sm:$0xff] %vm19_vm1, %v68_v12 }
  0x95   :  { %v63_v13 = vld [vmem:[%s153_s3 + $0x8] sm:$0xff] }
  0x96   :  { %v69_v14 = vadd.f32 %v83_v8, %v63_v13 }
  0x98   :  { %71 = vst.msk [vmem:[%s153_s3 + $0x8] sm:$0xff] %vm19_vm1, %v69_v14 }

// kernel: _lambda_.20
= control target key start
LH: loop header
LB: loop body
LE: loop exit
PB: predicated region body
PF: predicated region fallthrough
CT: control target
= control target key end

     0   :  { %vm29_vm0 = vcmask 261120   ;;  %v262_v4 = vmov 32.0   ;;  %s357_s0 = inlined_call_operand.vmem [shape: f32[16,32], index: 0, kind: input, shape index: {}]   ;;  %s358_s1 = inlined_call_operand.vmem [shape: f32[1,32], index: 1, kind: input, shape index: {}]   ;;  %s359_s2 = inlined_call_operand.vmem [shape: f32[1,32], index: 2, kind: input, shape index: {}]   ;;  %s360_s4 = inlined_call_operand.vmem [shape: f32[1,32], index: 4, kind: input, shape index: {}]   ;;  %s361_s3 = inlined_call_operand.vmem [shape: bf16[32,32], index: 3, kind: input, shape index: {}]   ;;  %s362_s6 = inlined_call_operand.vmem [shape: f32[1,32], index: 6, kind: input, shape index: {}]   ;;  %s363_s5 = inlined_call_operand.vmem [shape: bf16[32,32], index: 5, kind: input, shape index: {}]   ;;  %s364_s7 = inlined_call_operand.vmem [shape: f32[16,32], index: 7, kind: output, shape index: {}]  }
   0x1   :  { %v306_v0 = vld [vmem:[%s357_s0] sm:$0xff]  ;;  %v313_v2 = vld [vmem:[%s357_s0 + $0x8] sm:$0xff]  ;;  %248 = vrcp.f32 %v262_v4 }
   0x2   :  { %v30_v1 = vsel %vm29_vm0, %v306_v0, 0.0  ;;  %v33_v3 = vsel %vm29_vm0, %v313_v2, 0.0  ;;  %v240_v21 = vld [vmem:[%s361_s3 + $0x8] sm:$0xff]  ;;  %v239_v23 = vld [vmem:[%s361_s3] sm:$0xff] }
   0x3   :  { %31 = vadd.xlane.f32.xlu0 %v30_v1  ;;  %123 = vmatpush.bf16.msra.mxu0 %v240_v21  ;;  %v244_v42 = vld [vmem:[%s358_s1] ss:$0 sm:$0xff]  ;;  %v242_v55 = vld [vmem:[%s363_s5 + $0x8] sm:$0xff] }
   0x4   :  { %v245_v47 = vld [vmem:[%s359_s2] ss:$0 sm:$0xff]  ;;  %201 = vmatpush.bf16.msra.mxu1 %v242_v55 }
   0x5   :  { %v246_v52 = vld [vmem:[%s360_s4] ss:$0 sm:$0xff] }
   0x6   :  { %v241_v57 = vld [vmem:[%s363_s5] sm:$0xff] }
   0x7   :  { %v249_v5 = vpop.eup %248  ;;  %124 = vmatpush.bf16.msra.mxu0 %v239_v23 }
   0x8   :  { %v37_v6 = vmul.f32 32.0, %v249_v5  ;;  %vm41_vm1 = vweird.f32 %v249_v5  ;;  %202 = vmatpush.bf16.msra.mxu1 %v241_v57 }
   0xa   :  { %v38_v7 = vsub.f32 1.0, %v37_v6 }
   0xb   :  { %34 = vadd.xlane.f32.xlu0 %v33_v3 }
   0xc   :  { %v39_v8 = vmul.f32 %v249_v5, %v38_v7 }
   0xe   :  { %v40_v9 = vadd.f32 %v249_v5, %v39_v8 }
  0x10   :  { %v42_v10 = vsel %vm41_vm1, %v249_v5, %v40_v9 }
  0x76   :  { %v32_v11 = vpop.xlane.xlu0 %31 }
  0x77   :  { %v43_v12 = vmul.f32 %v42_v10, %v32_v11 }
  0x79   :  { %v45_v13 = vsub.f32 %v306_v0, %v43_v12 }
  0x7b   :  { %v47_v14 = vmul.f32 %v45_v13, %v45_v13 }
  0x7d   :  { %v49_v15 = vsel %vm29_vm0, %v47_v14, 0.0 }
  0x7e   :  { %50 = vadd.xlane.f32.xlu1 %v49_v15  ;;  %v35_v16 = vpop.xlane.xlu0 %34 }
  0x7f   :  { %v44_v17 = vmul.f32 %v42_v10, %v35_v16 }
  0x81   :  { %v46_v18 = vsub.f32 %v313_v2, %v44_v17 }
  0x83   :  { %v48_v19 = vmul.f32 %v46_v18, %v46_v18 }
  0x85   :  { %v52_v20 = vsel %vm29_vm0, %v48_v19, 0.0 }
  0x86   :  { %53 = vadd.xlane.f32.xlu1 %v52_v20 }
  0xf1   :  { %v51_v22 = vpop.xlane.xlu1 %50 }
  0xf2   :  { %v55_v24 = vmul.f32 %v51_v22, %v42_v10 }
  0xf4   :  { %v57_v25 = vadd.f32 1e-05, %v55_v24 }
  0xf6   :  { %250 = vrsqrt.f32 %v57_v25  ;;  %vm65_vm3 = vweird.f32 %v57_v25 }
  0xf9   :  { %v54_v26 = vpop.xlane.xlu1 %53 }
  0xfa   :  { %v56_v27 = vmul.f32 %v54_v26, %v42_v10  ;;  %v247_v26 = vld [vmem:[%s362_s6] ss:$0 sm:$0xff] }
  0xfc   :  { %v251_v28 = vpop.eup %250  ;;  %v58_v29 = vadd.f32 1e-05, %v56_v27 }
  0xfd   :  { %v60_v30 = vmul.f32 %v251_v28, %v57_v25  ;;  %vm66_vm2 = vweird.f32 %v251_v28 }
  0xfe   :  { %252 = vrsqrt.f32 %v58_v29  ;;  %vm67_vm4 = vmor %vm65_vm3, %vm66_vm2  ;;  %vm75_vm6 = vweird.f32 %v58_v29 }
  0xff   :  { %v61_v31 = vmul.f32 %v251_v28, %v60_v30 }
 0x101   :  { %v62_v32 = vmul.f32 0.5, %v61_v31 }
 0x103   :  { %v63_v33 = vsub.f32 1.5, %v62_v32 }
 0x104   :  { %v253_v34 = vpop.eup %252 }
 0x105   :  { %v64_v35 = vmul.f32 %v251_v28, %v63_v33  ;;  %v70_v36 = vmul.f32 %v253_v34, %v58_v29  ;;  %vm76_vm5 = vweird.f32 %v253_v34 }
 0x106   :  { %vm77_vm7 = vmor %vm75_vm6, %vm76_vm5 }
 0x107   :  { %v71_v37 = vmul.f32 %v253_v34, %v70_v36  ;;  %v68_v38 = vsel %vm67_vm4, %v251_v28, %v64_v35 }
 0x108   :  { %v79_v41 = vmul.f32 %v68_v38, %v45_v13 }
 0x109   :  { %v72_v39 = vmul.f32 0.5, %v71_v37 }
 0x10a   :  { %v85_v46 = vmul.f32 %v244_v42, %v79_v41 }
 0x10b   :  { %v73_v40 = vsub.f32 1.5, %v72_v39 }
 0x10c   :  { %v91_v49 = vadd.f32 %v245_v47, %v85_v46 }
 0x10d   :  { %v74_v43 = vmul.f32 %v253_v34, %v73_v40 }
 0x10f   :  { %v78_v44 = vsel %vm77_vm7, %v253_v34, %v74_v43 }
 0x110   :  { %v80_v45 = vmul.f32 %v78_v44, %v46_v18 }
 0x112   :  { %v86_v48 = vmul.f32 %v244_v42, %v80_v45 }
 0x114   :  { %v92_v50 = vadd.f32 %v245_v47, %v86_v48 }
 0x116   :  { %v93_v51 = vpack.c.bf16 %v92_v50, %v91_v49 }
 0x118   :  { %227 = vmatmul.msk.bf16.vlgmr.msra.gmra.mxu0 %vm29_vm0, %v93_v51 }
 0x195   :  { %v126_v53 = vpop.f32.mrf.mxu0 }
 0x196   :  { %v127_v54 = vadd.f32 %v246_v52, %v126_v53 }
 0x198   :  { %v228_v56 = vmul.f32 -1.442695, %v127_v54 }
 0x19a   :  { %254 = vpow2.f32 %v228_v56 }
 0x19d   :  { %v128_v58 = vpop.f32.mrf.mxu0 }
 0x19e   :  { %v129_v59 = vadd.f32 %v246_v52, %v128_v58 }
 0x1a0   :  { %v255_v60 = vpop.eup %254  ;;  %v229_v61 = vmul.f32 -1.442695, %v129_v59 }
 0x1a1   :  { %v137_v62 = vadd.f32 1.0, %v255_v60 }
 0x1a2   :  { %256 = vpow2.f32 %v229_v61 }
 0x1a3   :  { %258 = vrcp.f32 %v137_v62  ;;  %v150_v10 = vand.u32 2147483648, %v137_v62  ;;  %vm144_vm9 = vweird.f32 %v137_v62  ;;  %v148_v11 = vand.u32 2147483647, %v137_v62 }
 0x1a5   :  { %v151_v17 = vor.u32 1.1754944e-38, %v150_v10  ;;  %vm149_vm12 = vcmp.eq.f32.partialorder %v148_v11, 8.507059e+37 }
 0x1a8   :  { %v257_v63 = vpop.eup %256 }
 0x1a9   :  { %v259_v1 = vpop.eup %258  ;;  %v138_v3 = vadd.f32 1.0, %v257_v63 }
 0x1aa   :  { %v140_v4 = vmul.f32 %v259_v1, %v137_v62  ;;  %vm145_vm8 = vweird.f32 %v259_v1 }
 0x1ab   :  { %260 = vrcp.f32 %v138_v3  ;;  %vm146_vm10 = vmor %vm144_vm9, %vm145_vm8  ;;  %v165_v13 = vand.u32 2147483648, %v138_v3  ;;  %v163_v16 = vand.u32 2147483647, %v138_v3  ;;  %vm159_vm13 = vweird.f32 %v138_v3 }
 0x1ac   :  { %v141_v5 = vsub.f32 1.0, %v140_v4 }
 0x1ad   :  { %v166_v20 = vor.u32 1.1754944e-38, %v165_v13  ;;  %vm164_vm15 = vcmp.eq.f32.partialorder %v163_v16, 8.507059e+37 }
 0x1ae   :  { %v142_v6 = vmul.f32 %v259_v1, %v141_v5 }
 0x1b0   :  { %v143_v8 = vadd.f32 %v259_v1, %v142_v6 }
 0x1b1   :  { %v261_v7 = vpop.eup %260 }
 0x1b2   :  { %v155_v9 = vmul.f32 %v261_v7, %v138_v3  ;;  %v147_v14 = vsel %vm146_vm10, %v259_v1, %v143_v8  ;;  %vm160_vm11 = vweird.f32 %v261_v7 }
 0x1b3   :  { %v152_v19 = vsel %vm149_vm12, %v151_v17, %v147_v14  ;;  %vm161_vm14 = vmor %vm159_vm13, %vm160_vm11 }
 0x1b4   :  { %v156_v12 = vsub.f32 1.0, %v155_v9  ;;  %v169_v23 = vmul.f32 %v152_v19, %v127_v54 }
 0x1b6   :  { %v157_v15 = vmul.f32 %v261_v7, %v156_v12 }
 0x1b8   :  { %v158_v18 = vadd.f32 %v261_v7, %v157_v15 }
 0x1ba   :  { %v162_v21 = vsel %vm161_vm14, %v261_v7, %v158_v18 }
 0x1bb   :  { %v167_v22 = vsel %vm164_vm15, %v166_v20, %v162_v21 }
 0x1bc   :  { %v170_v24 = vmul.f32 %v167_v22, %v129_v59 }
 0x1be   :  { %v171_v25 = vpack.c.bf16 %v170_v24, %v169_v23 }
 0x1c0   :  { %238 = vmatmul.msk.bf16.vlgmr.msra.gmra.mxu1 %vm29_vm0, %v171_v25 }
 0x23d   :  { %v204_v27 = vpop.f32.mrf.mxu1 }
 0x23e   :  { %v205_v28 = vadd.f32 %v247_v26, %v204_v27 }
 0x240   :  { %v209_v29 = vmul.f32 0.5, %v205_v28 }
 0x242   :  { %v211_v30 = vadd.f32 %v209_v29, %v306_v0 }
 0x244   :  { %213 = vst.msk [vmem:[%s364_s7] sm:$0xff] %vm29_vm0, %v211_v30 }
 0x245   :  { %v206_v31 = vpop.f32.mrf.mxu1 }
 0x246   :  { %v207_v32 = vadd.f32 %v247_v26, %v206_v31 }
 0x248   :  { %v210_v33 = vmul.f32 0.5, %v207_v32 }
 0x24a   :  { %v212_v34 = vadd.f32 %v210_v33, %v313_v2 }
 0x24c   :  { %214 = vst.msk [vmem:[%s364_s7 + $0x8] sm:$0xff] %vm29_vm0, %v212_v34 }

// kernel: _lambda_.22
= control target key start
LH: loop header
LB: loop body
LE: loop exit
PB: predicated region body
PF: predicated region fallthrough
CT: control target
= control target key end

     0   :  { %s647_s12 = smov 0   ;;  %s706_s0 = inlined_call_operand.vmem [shape: f32[2,8,32], index: 0, kind: input, shape index: {}]   ;;  %s707_s1 = inlined_call_operand.vmem [shape: f32[2,8,32], index: 1, kind: input, shape index: {}]   ;;  %s708_s2 = inlined_call_operand.vmem [shape: f32[2,8,32], index: 2, kind: input, shape index: {}]   ;;  %s709_s3 = inlined_call_operand.vmem [shape: f32[2,8,32], index: 3, kind: output, shape index: {}]  }
   0x1 LB: > { %s560_s13 = sadd.s32 4294967295, %s619_s12   ;;  %p564_p0 = scmp.ge.s32.totalorder %s619_s12, 1  ;;  %s619_s12 = sphi %s647_s12, %s13_s12  }
   0x2   : > { %p154_p1 = scmp.lt.s32.totalorder %s619_s12, 3 }
   0x4   : > { %p155_p2 = pnand %p564_p0, %p154_p1 }
   0x5   : > { %p184_p3 = scmp.lt.s32.totalorder (!%p155_p2), %s560_s13, 1  ;;  %s621_s21 = smov (!%p155_p2), 120  }
   0x6   : > { %158 = sbr.rel (%p155_p2) target bundleno = 1042 (0x412), region = 32  ;;  %s622_s22 = smov (!%p155_p2), 112  }
   0x7   : > { %s623_s23 = smov (!%p155_p2), 104   ;;  %s624_s27 = smov (!%p155_p2), 8  }
   0x8   : > { %s625_s28 = smov (!%p155_p2), 24   ;;  %s626_s29 = smov (!%p155_p2), 16  }
   0xb   : > { %s711_s13 = smov (!%p184_p3, %s560_s13), 1  ;;  %vm203_vm0 = vcmask 64512   ;;  %vm477_vm1 = vcmask 130048   ;;  %vm479_vm2 = vcmask 195584   ;;  %vm481_vm3 = vcmask 261120  }
   0xc   : > { %s655_s14 = sshll.u32 %s711_s13, 3 }
   0xd   : > { %s191_s17 = scalar_lea.vmem %s707_s1, %s655_s14  ;;  %s187_s20 = scalar_lea.vmem %s706_s0, %s655_s14 }
   0xe   : > { %v201_v0 = vld [vmem:[%s191_s17] sm:$0xff]  ;;  %s195_s26 = scalar_lea.vmem %s708_s2, %s655_s14  ;;  %s199_s5 = scalar_lea.vmem %s709_s3, %s655_s14 }
   0xf   : > { %569 = vmatpush.xpose.msk.msra.mxu0 %vm203_vm0, %v201_v0  ;;  %v200_v1 = vld [vmem:[%s187_s20] sm:$0xff]  ;;  %267 = vrot.lane.b32.xlu1 %v201_v0, %s621_s21 }
  0x10   : > { %334 = vrot.lane.b32.xlu2 %v201_v0, %s622_s22  ;;  %v202_v18 = vld [vmem:[%s195_s26] sm:$0xff] }
  0x11   : > { %260 = vmatpush.msra.mxu1 %v202_v18 }
  0x12   : > { %570 = vmatmul.msk.f32.vlgmr.msra.gmra.mxu0 %vm203_vm0, %v200_v1 }
  0x17   : > { %265 = vrot.lane.b32.xlu1 %v200_v1, %s621_s21 }
  0x18   : > { %400 = vrot.lane.b32.xlu2 %v201_v0, %s623_s23 }
  0x1f   : > { %398 = vrot.lane.b32.xlu1 %v200_v1, %s623_s23 }
  0x6a   : > { %v335_v2 = vpop.permute.xlu2 %334 }
  0x6b   : > { %575 = vmatpush.xpose.msk.msrb.mxu1 %vm203_vm0, %v335_v2 }
  0x72   : > { %v401_v3 = vpop.permute.xlu2 %400 }
  0x73   : > { %578 = vmatpush.xpose.msk.msrb.mxu0 %vm203_vm0, %v401_v3 }
  0x81   : > { %v268_v4 = vpop.permute.xlu1 %267 }
  0x82   : > { %572 = vmatpush.xpose.msk.msra.mxu2 %vm203_vm0, %v268_v4 }
  0x89   : > { %v266_v5 = vpop.permute.xlu1 %265 }
  0x8a   : > { %573 = vmatmul.msk.f32.vlgmr.msra.gmra.mxu2 %vm203_vm0, %v266_v5 }
  0x8f   : > { %v227_v6 = vpop.f32.mrf.mxu0 }
  0x90   : > { %v230_v7 = vmul.f32 0.35355338, %v227_v6 }
  0x91   : > { %v399_v8 = vpop.permute.xlu1 %398 }
  0x92   : > { %v231_v9 = vsel %vm203_vm0, %v230_v7, -inf  ;;  %579 = vmatmul.msk.f32.vlgmr.msrb.gmra.mxu0 %vm203_vm0, %v399_v8 }
  0x93   : > { %232 = vmax.xlane.f32.xlu0 %v231_v9 }
 0x106   : > { %v233_v10 = vpop.xlane.xlu0 %232 }
 0x107   : > { %v234_v11 = vsub.f32 %v230_v7, %v233_v10 }
 0x109   : > { %v235_v12 = vmul.f32 1.442695, %v234_v11 }
 0x10b   : > { %597 = vpow2.f32 %v235_v12 }
 0x10d   : > { %v290_v13 = vpop.f32.mrf.mxu2 }
 0x10e   : > { %v293_v14 = vmul.f32 0.35355338, %v290_v13 }
 0x10f   : > { %v423_v19 = vpop.f32.mrf.mxu0 }
 0x110   : > { %v294_v15 = vsel %vm203_vm0, %v293_v14, -inf  ;;  %v426_v20 = vmul.f32 0.35355338, %v423_v19 }
 0x111   : > { %v598_v16 = vpop.eup %597  ;;  %295 = vmax.xlane.f32.xlu2 %v294_v15 }
 0x112   : > { %v237_v17 = vsel %vm203_vm0, %v598_v16, 0.0  ;;  %v427_v21 = vsel %vm203_vm0, %v426_v20, -inf }
 0x113   : > { %238 = vadd.xlane.f32.xlu0 %v237_v17 }
 0x127   : > { %332 = vrot.lane.b32.xlu0 %v200_v1, %s622_s22 }
 0x151   : > { %428 = vmax.xlane.f32.xlu0 %v427_v21 }
 0x165   : > { %372 = vrot.lane.b32.xlu0 %v202_v18, %s622_s22 }
 0x184   : > { %v296_v22 = vpop.xlane.xlu2 %295 }
 0x185   : > { %v297_v23 = vsub.f32 %v293_v14, %v296_v22 }
 0x186   : > { %v239_v24 = vpop.xlane.xlu0 %238 }
 0x187   : > { %599 = vrcp.f32 %v239_v24  ;;  %v298_v25 = vmul.f32 1.442695, %v297_v23 }
 0x189   : > { %601 = vpow2.f32 %v298_v25 }
 0x18d   : > { %v600_v26 = vpop.eup %599 }
 0x18e   : > { %v241_v27 = vmul.f32 %v600_v26, %v598_v16 }
 0x18f   : > { %v602_v28 = vpop.eup %601 }
 0x190   : > { %571 = vmatmul.msk.f32.vlgmr.msra.gmra.mxu1 %vm203_vm0, %v241_v27  ;;  %v300_v29 = vsel %vm203_vm0, %v602_v28, 0.0 }
 0x191   : > { %301 = vadd.xlane.f32.xlu2 %v300_v29 }
 0x199   : > { %v333_v30 = vpop.permute.xlu0 %332 }
 0x19a   : > { %576 = vmatmul.msk.f32.vlgmr.msrb.gmra.mxu1 %vm203_vm0, %v333_v30 }
 0x1c4   : > { %v429_v31 = vpop.xlane.xlu0 %428 }
 0x1c5   : > { %v430_v32 = vsub.f32 %v426_v20, %v429_v31 }
 0x1c7   : > { %v431_v33 = vmul.f32 1.442695, %v430_v32 }
 0x1c9   : > { %603 = vpow2.f32 %v431_v33 }
 0x1cf   : > { %v604_v34 = vpop.eup %603 }
 0x1d0   : > { %v433_v35 = vsel %vm203_vm0, %v604_v34, 0.0 }
 0x1d1   : > { %434 = vadd.xlane.f32.xlu2 %v433_v35 }
 0x1d7   : > { %v373_v49 = vpop.permute.xlu0 %372 }
 0x204   : > { %v302_v44 = vpop.xlane.xlu2 %301 }
 0x20d   : > { %v262_v36 = vpop.f32.mrf.mxu1 }
 0x217   : > { %v357_v37 = vpop.f32.mrf.mxu1 }
 0x218   : > { %v360_v38 = vmul.f32 0.35355338, %v357_v37 }
 0x21a   : > { %v361_v39 = vsel %vm203_vm0, %v360_v38, -inf }
 0x21b   : > { %362 = vmax.xlane.f32.xlu1 %v361_v39 }
 0x234   : > { %306 = vrot.lane.b32.xlu1 %v202_v18, %s621_s21 }
 0x244   : > { %v435_v50 = vpop.xlane.xlu2 %434 }
 0x28e   : > { %v363_v40 = vpop.xlane.xlu1 %362 }
 0x28f   : > { %v364_v41 = vsub.f32 %v360_v38, %v363_v40 }
 0x291   : > { %v365_v42 = vmul.f32 1.442695, %v364_v41 }
 0x293   : > { %605 = vpow2.f32 %v365_v42 }
 0x294   : > { %607 = vrcp.f32 %v302_v44 }
 0x295   : > { %609 = vrcp.f32 %v435_v50 }
 0x299   : > { %v606_v43 = vpop.eup %605 }
 0x29a   : > { %v367_v45 = vsel %vm203_vm0, %v606_v43, 0.0  ;;  %v608_v46 = vpop.eup %607 }
 0x29b   : > { %368 = vadd.xlane.f32.xlu2 %v367_v45  ;;  %v304_v48 = vmul.f32 %v608_v46, %v602_v28  ;;  %v610_v52 = vpop.eup %609 }
 0x29c   : > { %v437_v56 = vmul.f32 %v610_v52, %v604_v34 }
 0x2a6   : > { %v307_v47 = vpop.permute.xlu1 %306 }
 0x2a7   : > { %327 = vmatpush.msra.mxu3 %v307_v47 }
 0x2a8   : > { %574 = vmatmul.msk.f32.vlgmr.msra.gmra.mxu3 %vm203_vm0, %v304_v48 }
 0x2a9   : > { %393 = vmatpush.msrb.mxu3 %v373_v49 }
 0x2b3   : > { %438 = vrot.lane.b32.xlu2 %v202_v18, %s623_s23 }
 0x30e   : > { %v369_v51 = vpop.xlane.xlu2 %368 }
 0x30f   : > { %611 = vrcp.f32 %v369_v51 }
 0x315   : > { %v612_v53 = vpop.eup %611 }
 0x316   : > { %v439_v54 = vpop.permute.xlu2 %438  ;;  %v371_v55 = vmul.f32 %v612_v53, %v606_v43 }
 0x317   : > { %459 = vmatpush.msrb.mxu2 %v439_v54 }
 0x318   : > { %577 = vmatmul.msk.f32.vlgmr.msrb.gmra.mxu3 %vm203_vm0, %v371_v55  ;;  %580 = vmatmul.msk.f32.vlgmr.msrb.gmra.mxu2 %vm203_vm0, %v437_v56 }
 0x32b   : > { %v329_v57 = vpop.f32.mrf.mxu3 }
 0x32c   : > { %465 = vrot.lane.b32.xlu1 %v329_v57, %s624_s27 }
 0x39b   : > { %v395_v58 = vpop.f32.mrf.mxu3  ;;  %v461_v59 = vpop.f32.mrf.mxu2 }
 0x39c   : > { %473 = vrot.lane.b32.xlu1 %v461_v59, %s625_s28  ;;  %469 = vrot.lane.b32.xlu0 %v395_v58, %s626_s29 }
 0x39e   : > { %v466_v60 = vpop.permute.xlu1 %465 }
 0x39f   : > { %v476_v61 = vsel %vm203_vm0, %v262_v36, %v466_v60 }
 0x40e   : > { %v474_v62 = vpop.permute.xlu1 %473  ;;  %v470_v63 = vpop.permute.xlu0 %469 }
 0x40f   : > { %v478_v0 = vsel %vm477_vm1, %v476_v61, %v470_v63 }
 0x410   : > { %v480_v1 = vsel %vm479_vm2, %v478_v0, %v474_v62 }
 0x411   : > { %482 = vst.msk [vmem:[%s199_s5] sm:$0xff] %vm481_vm3, %v480_v1 }
 0x412 PF: > { %s13_s12 = sadd.s32 1, %s619_s12  }
 0x413   : > { %p10_p4 = scmp.ge.s32.totalorder %s13_s12, 4  }
 0x415   :  { %12 = sbr.rel (!%p10_p4) target bundleno = 1 (0x1), region = 68 }

// kernel: _lambda_.23
= control target key start
LH: loop header
LB: loop body
LE: loop exit
PB: predicated region body
PF: predicated region fallthrough
CT: control target
= control target key end

     0   :  { %vm22_vm0 = vcmask 261120   ;;  %v111_v1 = vmov 0.0   ;;  %s192_s1 = inlined_call_operand.vmem [shape: bf16[32,32], index: 1, kind: input, shape index: {}]   ;;  %s193_s4 = inlined_call_operand.vmem [shape: f32[16,32], index: 4, kind: output, shape index: {}]   ;;  %s194_s2 = inlined_call_operand.vmem [shape: f32[1,32], index: 2, kind: input, shape index: {}]   ;;  %s195_s0 = inlined_call_operand.vmem [shape: bf16[16,32], index: 0, kind: input, shape index: {}]   ;;  %s196_s3 = inlined_call_operand.vmem [shape: f32[16,32], index: 3, kind: input, shape index: {}]  }
   0x1   :  { %v108_v0 = vld [vmem:[%s192_s1 + $0x8] sm:$0xff]  ;;  %23 = vst.msk [vmem:[%s193_s4] sm:$0xff] %vm22_vm0, %v111_v1  ;;  %v107_v2 = vld [vmem:[%s192_s1] sm:$0xff] }
   0x2   :  { %24 = vst.msk [vmem:[%s193_s4 + $0x8] sm:$0xff] %vm22_vm0, %v111_v1  ;;  %60 = vmatpush.bf16.msra.mxu0 %v108_v0  ;;  %v106_v3 = vld [vmem:[%s195_s0] sm:$0xff]  ;;  %v84_v16 = vld [vmem:[%s196_s3 + $0x8] sm:$0xff] }
   0x3   :  { %v110_v8 = vld [vmem:[%s194_s2] ss:$0 sm:$0xff] }
   0x4   :  { %v83_v12 = vld [vmem:[%s196_s3] sm:$0xff] }
   0x6   :  { %61 = vmatpush.bf16.msra.mxu0 %v107_v2 }
   0x8   :  { %v25_v4 = vld [vmem:[%s193_s4] sm:$0xff] }
   0x9   :  { %105 = vmatmul.msk.bf16.vlgmr.msra.gmra.mxu0 %vm22_vm0, %v106_v3  ;;  %v26_v7 = vld [vmem:[%s193_s4 + $0x8] sm:$0xff] }
  0x86   :  { %v63_v5 = vpop.f32.mrf.mxu0 }
  0x87   :  { %v68_v6 = vadd.f32 %v63_v5, %v25_v4 }
  0x89   :  { %70 = vst.msk [vmem:[%s193_s4] sm:$0xff] %vm22_vm0, %v68_v6 }
  0x8e   :  { %v65_v9 = vpop.f32.mrf.mxu0 }
  0x8f   :  { %v69_v10 = vadd.f32 %v65_v9, %v26_v7 }
  0x90   :  { %v75_v11 = vld [vmem:[%s193_s4] sm:$0xff] }
  0x91   :  { %v81_v13 = vadd.f32 %v110_v8, %v75_v11  ;;  %71 = vst.msk [vmem:[%s193_s4 + $0x8] sm:$0xff] %vm22_vm0, %v69_v10 }
  0x93   :  { %v85_v14 = vadd.f32 %v83_v12, %v81_v13 }
  0x95   :  { %87 = vst.msk [vmem:[%s193_s4] sm:$0xff] %vm22_vm0, %v85_v14 }
  0x98   :  { %v76_v15 = vld [vmem:[%s193_s4 + $0x8] sm:$0xff] }
  0x99   :  { %v82_v17 = vadd.f32 %v110_v8, %v76_v15 }
  0x9b   :  { %v86_v18 = vadd.f32 %v84_v16, %v82_v17 }
  0x9d   :  { %88 = vst.msk [vmem:[%s193_s4 + $0x8] sm:$0xff] %vm22_vm0, %v86_v18 }

// kernel: _lambda_.24
= control target key start
LH: loop header
LB: loop body
LE: loop exit
PB: predicated region body
PF: predicated region fallthrough
CT: control target
= control target key end

     0   :  { %vm23_vm0 = vcmask 261120   ;;  %v211_v4 = vmov 32.0   ;;  %s277_s0 = inlined_call_operand.vmem [shape: f32[16,32], index: 0, kind: input, shape index: {}]   ;;  %s278_s1 = inlined_call_operand.vmem [shape: f32[1,32], index: 1, kind: input, shape index: {}]   ;;  %s279_s2 = inlined_call_operand.vmem [shape: f32[1,32], index: 2, kind: input, shape index: {}]   ;;  %s280_s4 = inlined_call_operand.vmem [shape: f32[1,64], index: 4, kind: input, shape index: {}]   ;;  %s281_s3 = inlined_call_operand.vmem [shape: bf16[32,64], index: 3, kind: input, shape index: {}]   ;;  %s282_s5 = inlined_call_operand.vmem [shape: f32[16,32], index: 5, kind: output, shape index: {}]  }
   0x1   :  { %v21_v0 = vld [vmem:[%s277_s0] sm:$0xff]  ;;  %v22_v2 = vld [vmem:[%s277_s0 + $0x8] sm:$0xff]  ;;  %197 = vrcp.f32 %v211_v4 }
   0x2   :  { %v24_v1 = vsel %vm23_vm0, %v21_v0, 0.0  ;;  %v27_v3 = vsel %vm23_vm0, %v22_v2, 0.0  ;;  %v191_v21 = vld [vmem:[%s281_s3 + $0x8] sm:$0xff]  ;;  %v190_v23 = vld [vmem:[%s281_s3] sm:$0xff] }
   0x3   :  { %25 = vadd.xlane.f32.xlu0 %v24_v1  ;;  %117 = vmatpush.bf16.msra.mxu0 %v191_v21  ;;  %v194_v42 = vld [vmem:[%s278_s1] ss:$0 sm:$0xff]  ;;  %s212_s1 = smov 96  }
   0x4   :  { %v195_v47 = vld [vmem:[%s279_s2] ss:$0 sm:$0xff] }
   0x5   :  { %v196_v52 = vld [vmem:[%s280_s4] ss:$0 sm:$0xff] }
   0x7   :  { %v198_v5 = vpop.eup %197  ;;  %118 = vmatpush.bf16.msra.mxu0 %v190_v23 }
   0x8   :  { %v31_v6 = vmul.f32 32.0, %v198_v5  ;;  %vm35_vm1 = vweird.f32 %v198_v5 }
   0xa   :  { %v32_v7 = vsub.f32 1.0, %v31_v6 }
   0xb   :  { %28 = vadd.xlane.f32.xlu0 %v27_v3 }
   0xc   :  { %v33_v8 = vmul.f32 %v198_v5, %v32_v7 }
   0xe   :  { %v34_v9 = vadd.f32 %v198_v5, %v33_v8 }
  0x10   :  { %v36_v10 = vsel %vm35_vm1, %v198_v5, %v34_v9 }
  0x76   :  { %v26_v11 = vpop.xlane.xlu0 %25 }
  0x77   :  { %v37_v12 = vmul.f32 %v36_v10, %v26_v11 }
  0x79   :  { %v39_v13 = vsub.f32 %v21_v0, %v37_v12 }
  0x7b   :  { %v41_v14 = vmul.f32 %v39_v13, %v39_v13 }
  0x7d   :  { %v43_v15 = vsel %vm23_vm0, %v41_v14, 0.0 }
  0x7e   :  { %44 = vadd.xlane.f32.xlu1 %v43_v15  ;;  %v29_v16 = vpop.xlane.xlu0 %28 }
  0x7f   :  { %v38_v17 = vmul.f32 %v36_v10, %v29_v16 }
  0x81   :  { %v40_v18 = vsub.f32 %v22_v2, %v38_v17 }
  0x83   :  { %v42_v19 = vmul.f32 %v40_v18, %v40_v18 }
  0x85   :  { %v46_v20 = vsel %vm23_vm0, %v42_v19, 0.0 }
  0x86   :  { %47 = vadd.xlane.f32.xlu1 %v46_v20 }
  0xf1   :  { %v45_v22 = vpop.xlane.xlu1 %44 }
  0xf2   :  { %v49_v24 = vmul.f32 %v45_v22, %v36_v10 }
  0xf4   :  { %v51_v25 = vadd.f32 1e-05, %v49_v24 }
  0xf6   :  { %199 = vrsqrt.f32 %v51_v25  ;;  %vm59_vm3 = vweird.f32 %v51_v25 }
  0xf9   :  { %v48_v26 = vpop.xlane.xlu1 %47 }
  0xfa   :  { %v50_v27 = vmul.f32 %v48_v26, %v36_v10 }
  0xfc   :  { %v200_v28 = vpop.eup %199  ;;  %v52_v29 = vadd.f32 1e-05, %v50_v27 }
  0xfd   :  { %v54_v30 = vmul.f32 %v200_v28, %v51_v25  ;;  %vm60_vm2 = vweird.f32 %v200_v28 }
  0xfe   :  { %201 = vrsqrt.f32 %v52_v29  ;;  %vm61_vm4 = vmor %vm59_vm3, %vm60_vm2  ;;  %vm69_vm6 = vweird.f32 %v52_v29 }
  0xff   :  { %v55_v31 = vmul.f32 %v200_v28, %v54_v30 }
 0x101   :  { %v56_v32 = vmul.f32 0.5, %v55_v31 }
 0x103   :  { %v57_v33 = vsub.f32 1.5, %v56_v32 }
 0x104   :  { %v202_v34 = vpop.eup %201 }
 0x105   :  { %v58_v35 = vmul.f32 %v200_v28, %v57_v33  ;;  %v64_v36 = vmul.f32 %v202_v34, %v52_v29  ;;  %vm70_vm5 = vweird.f32 %v202_v34 }
 0x106   :  { %vm71_vm7 = vmor %vm69_vm6, %vm70_vm5 }
 0x107   :  { %v65_v37 = vmul.f32 %v202_v34, %v64_v36  ;;  %v62_v38 = vsel %vm61_vm4, %v200_v28, %v58_v35 }
 0x108   :  { %v73_v41 = vmul.f32 %v62_v38, %v39_v13 }
 0x109   :  { %v66_v39 = vmul.f32 0.5, %v65_v37 }
 0x10a   :  { %v79_v46 = vmul.f32 %v194_v42, %v73_v41 }
 0x10b   :  { %v67_v40 = vsub.f32 1.5, %v66_v39 }
 0x10c   :  { %v85_v49 = vadd.f32 %v195_v47, %v79_v46 }
 0x10d   :  { %v68_v43 = vmul.f32 %v202_v34, %v67_v40 }
 0x10f   :  { %v72_v44 = vsel %vm71_vm7, %v202_v34, %v68_v43 }
 0x110   :  { %v74_v45 = vmul.f32 %v72_v44, %v40_v18 }
 0x112   :  { %v80_v48 = vmul.f32 %v194_v42, %v74_v45 }
 0x114   :  { %v86_v50 = vadd.f32 %v195_v47, %v80_v48 }
 0x116   :  { %v87_v51 = vpack.c.bf16 %v86_v50, %v85_v49 }
 0x118   :  { %187 = vmatmul.msk.bf16.vlgmr.msra.gmra.mxu0 %vm23_vm0, %v87_v51 }
 0x195   :  { %v120_v53 = vpop.f32.mrf.mxu0 }
 0x196   :  { %v121_v54 = vadd.f32 %v196_v52, %v120_v53 }
 0x198   :  { %v188_v55 = vmul.f32 -1.442695, %v121_v54 }
 0x19a   :  { %203 = vpow2.f32 %v188_v55 }
 0x19d   :  { %v122_v56 = vpop.f32.mrf.mxu0 }
 0x19e   :  { %v123_v57 = vadd.f32 %v196_v52, %v122_v56 }
 0x1a0   :  { %v204_v58 = vpop.eup %203  ;;  %v189_v59 = vmul.f32 -1.442695, %v123_v57 }
 0x1a1   :  { %v131_v60 = vadd.f32 1.0, %v204_v58 }
 0x1a2   :  { %205 = vpow2.f32 %v189_v59 }
 0x1a3   :  { %207 = vrcp.f32 %v131_v60  ;;  %v144_v2 = vand.u32 2147483648, %v131_v60  ;;  %v142_v4 = vand.u32 2147483647, %v131_v60  ;;  %vm138_vm9 = vweird.f32 %v131_v60 }
 0x1a5   :  { %v145_v7 = vor.u32 1.1754944e-38, %v144_v2  ;;  %vm143_vm11 = vcmp.eq.f32.partialorder %v142_v4, 8.507059e+37 }
 0x1a8   :  { %v206_v61 = vpop.eup %205 }
 0x1a9   :  { %v208_v62 = vpop.eup %207  ;;  %v132_v63 = vadd.f32 1.0, %v206_v61 }
 0x1aa   :  { %v134_v0 = vmul.f32 %v208_v62, %v131_v60  ;;  %vm139_vm8 = vweird.f32 %v208_v62 }
 0x1ab   :  { %209 = vrcp.f32 %v132_v63  ;;  %vm140_vm10 = vmor %vm138_vm9, %vm139_vm8  ;;  %v159_v12 = vand.u32 2147483648, %v132_v63  ;;  %v157_v14 = vand.u32 2147483647, %v132_v63  ;;  %vm153_vm13 = vweird.f32 %v132_v63 }
 0x1ac   :  { %v135_v1 = vsub.f32 1.0, %v134_v0 }
 0x1ad   :  { %v160_v16 = vor.u32 1.1754944e-38, %v159_v12  ;;  %vm158_vm15 = vcmp.eq.f32.partialorder %v157_v14, 8.507059e+37 }
 0x1ae   :  { %v136_v3 = vmul.f32 %v208_v62, %v135_v1 }
 0x1b0   :  { %v137_v5 = vadd.f32 %v208_v62, %v136_v3 }
 0x1b1   :  { %v210_v6 = vpop.eup %209 }
 0x1b2   :  { %v141_v8 = vsel %vm140_vm10, %v208_v62, %v137_v5  ;;  %v149_v9 = vmul.f32 %v210_v6, %v132_v63  ;;  %vm154_vm12 = vweird.f32 %v210_v6 }
 0x1b3   :  { %v146_v10 = vsel %vm143_vm11, %v145_v7, %v141_v8  ;;  %vm155_vm14 = vmor %vm153_vm13, %vm154_vm12 }
 0x1b4   :  { %165 = vrot.lane.b32.xlu2 %v146_v10, %s212_s1  ;;  %v150_v11 = vsub.f32 1.0, %v149_v9 }
 0x1b6   :  { %v151_v13 = vmul.f32 %v210_v6, %v150_v11 }
 0x1b8   :  { %v152_v15 = vadd.f32 %v210_v6, %v151_v13 }
 0x1ba   :  { %v156_v17 = vsel %vm155_vm14, %v210_v6, %v152_v15 }
 0x1bb   :  { %v161_v18 = vsel %vm158_vm15, %v160_v16, %v156_v17 }
 0x1bc   :  { %167 = vrot.lane.b32.xlu2 %v161_v18, %s212_s1 }
 0x20e   :  { %v166_v19 = vpop.permute.xlu2 %165 }
 0x20f   :  { %v171_v20 = vmul.f32 %v166_v19, %v121_v54 }
 0x211   :  { %173 = vst.msk [vmem:[%s282_s5] sm:$0xff] %vm23_vm0, %v171_v20 }
 0x216   :  { %v168_v21 = vpop.permute.xlu2 %167 }
 0x217   :  { %v172_v22 = vmul.f32 %v168_v21, %v123_v57 }
 0x219   :  { %174 = vst.msk [vmem:[%s282_s5 + $0x8] sm:$0xff] %vm23_vm0, %v172_v22 }

// kernel: _lambda_.28
= control target key start
LH: loop header
LB: loop body
LE: loop exit
PB: predicated region body
PF: predicated region fallthrough
CT: control target
= control target key end

     0   :  { %vm16_vm0 = vcmask 261120   ;;  %v95_v4 = vmov 32.0   ;;  %s140_s0 = inlined_call_operand.vmem [shape: f32[16,32], index: 0, kind: input, shape index: {}]   ;;  %s141_s1 = inlined_call_operand.vmem [shape: f32[1,32], index: 1, kind: input, shape index: {}]   ;;  %s142_s2 = inlined_call_operand.vmem [shape: f32[1,32], index: 2, kind: input, shape index: {}]   ;;  %s143_s3 = inlined_call_operand.vmem [shape: f32[16,32], index: 3, kind: output, shape index: {}]  }
   0x1   :  { %v14_v0 = vld [vmem:[%s140_s0] sm:$0xff]  ;;  %v15_v2 = vld [vmem:[%s140_s0 + $0x8] sm:$0xff]  ;;  %89 = vrcp.f32 %v95_v4 }
   0x2   :  { %v17_v1 = vsel %vm16_vm0, %v14_v0, 0.0  ;;  %v20_v3 = vsel %vm16_vm0, %v15_v2, 0.0  ;;  %v87_v35 = vld [vmem:[%s141_s1] ss:$0 sm:$0xff] }
   0x3   :  { %18 = vadd.xlane.f32.xlu0 %v17_v1  ;;  %v88_v38 = vld [vmem:[%s142_s2] ss:$0 sm:$0xff] }
   0x7   :  { %v90_v5 = vpop.eup %89 }
   0x8   :  { %v24_v6 = vmul.f32 32.0, %v90_v5  ;;  %vm28_vm1 = vweird.f32 %v90_v5 }
   0xa   :  { %v25_v7 = vsub.f32 1.0, %v24_v6 }
   0xb   :  { %21 = vadd.xlane.f32.xlu0 %v20_v3 }
   0xc   :  { %v26_v8 = vmul.f32 %v90_v5, %v25_v7 }
   0xe   :  { %v27_v9 = vadd.f32 %v90_v5, %v26_v8 }
  0x10   :  { %v29_v10 = vsel %vm28_vm1, %v90_v5, %v27_v9 }
  0x76   :  { %v19_v11 = vpop.xlane.xlu0 %18 }
  0x77   :  { %v30_v12 = vmul.f32 %v29_v10, %v19_v11 }
  0x79   :  { %v32_v13 = vsub.f32 %v14_v0, %v30_v12 }
  0x7b   :  { %v34_v14 = vmul.f32 %v32_v13, %v32_v13 }
  0x7d   :  { %v36_v15 = vsel %vm16_vm0, %v34_v14, 0.0 }
  0x7e   :  { %37 = vadd.xlane.f32.xlu1 %v36_v15  ;;  %v22_v16 = vpop.xlane.xlu0 %21 }
  0x7f   :  { %v31_v17 = vmul.f32 %v29_v10, %v22_v16 }
  0x81   :  { %v33_v18 = vsub.f32 %v15_v2, %v31_v17 }
  0x83   :  { %v35_v19 = vmul.f32 %v33_v18, %v33_v18 }
  0x85   :  { %v39_v20 = vsel %vm16_vm0, %v35_v19, 0.0 }
  0x86   :  { %40 = vadd.xlane.f32.xlu1 %v39_v20 }
  0xf1   :  { %v38_v21 = vpop.xlane.xlu1 %37 }
  0xf2   :  { %v42_v22 = vmul.f32 %v38_v21, %v29_v10 }
  0xf4   :  { %v44_v23 = vadd.f32 1e-05, %v42_v22 }
  0xf6   :  { %91 = vrsqrt.f32 %v44_v23  ;;  %vm52_vm3 = vweird.f32 %v44_v23 }
  0xf9   :  { %v41_v24 = vpop.xlane.xlu1 %40 }
  0xfa   :  { %v43_v25 = vmul.f32 %v41_v24, %v29_v10 }
  0xfc   :  { %v92_v26 = vpop.eup %91  ;;  %v45_v27 = vadd.f32 1e-05, %v43_v25 }
  0xfd   :  { %v47_v28 = vmul.f32 %v92_v26, %v44_v23  ;;  %vm53_vm2 = vweird.f32 %v92_v26 }
  0xfe   :  { %93 = vrsqrt.f32 %v45_v27  ;;  %vm54_vm4 = vmor %vm52_vm3, %vm53_vm2  ;;  %vm62_vm6 = vweird.f32 %v45_v27 }
  0xff   :  { %v48_v29 = vmul.f32 %v92_v26, %v47_v28 }
 0x101   :  { %v49_v30 = vmul.f32 0.5, %v48_v29 }
 0x103   :  { %v50_v31 = vsub.f32 1.5, %v49_v30 }
 0x104   :  { %v94_v32 = vpop.eup %93 }
 0x105   :  { %v51_v33 = vmul.f32 %v92_v26, %v50_v31  ;;  %v57_v34 = vmul.f32 %v94_v32, %v45_v27  ;;  %vm63_vm5 = vweird.f32 %v94_v32 }
 0x106   :  { %vm64_vm7 = vmor %vm62_vm6, %vm63_vm5 }
 0x107   :  { %v55_v36 = vsel %vm54_vm4, %v92_v26, %v51_v33  ;;  %v58_v37 = vmul.f32 %v94_v32, %v57_v34 }
 0x108   :  { %v66_v39 = vmul.f32 %v55_v36, %v32_v13 }
 0x109   :  { %v59_v40 = vmul.f32 0.5, %v58_v37 }
 0x10a   :  { %v72_v41 = vmul.f32 %v87_v35, %v66_v39 }
 0x10b   :  { %v60_v42 = vsub.f32 1.5, %v59_v40 }
 0x10c   :  { %v78_v43 = vadd.f32 %v88_v38, %v72_v41 }
 0x10d   :  { %v61_v44 = vmul.f32 %v94_v32, %v60_v42 }
 0x10e   :  { %80 = vst.msk [vmem:[%s143_s3] sm:$0xff] %vm16_vm0, %v78_v43 }
 0x10f   :  { %v65_v45 = vsel %vm64_vm7, %v94_v32, %v61_v44 }
 0x110   :  { %v67_v46 = vmul.f32 %v65_v45, %v33_v18 }
 0x112   :  { %v73_v47 = vmul.f32 %v87_v35, %v67_v46 }
 0x114   :  { %v79_v48 = vadd.f32 %v88_v38, %v73_v47 }
 0x116   :  { %81 = vst.msk [vmem:[%s143_s3 + $0x8] sm:$0xff] %vm16_vm0, %v79_v48 }

// kernel: _lambda_.25
= control target key start
LH: loop header
LB: loop body
LE: loop exit
PB: predicated region body
PF: predicated region fallthrough
CT: control target
= control target key end

     0   :  { %vm40_vm0 = vcmask 1046528   ;;  %vm60_vm1 = vcmask 1045504   ;;  %vm80_vm2 = vcmask 1044480   ;;  %vm100_vm3 = vcmask 1043456   ;;  %s936_s0 = inlined_call_operand.vmem [shape: f32[2,38,32], index: 0, kind: input, shape index: {}]   ;;  %s937_s1 = inlined_call_operand.vmem [shape: f32[31,32], index: 1, kind: input, shape index: {}]   ;;  %s938_s2 = inlined_call_operand.vmem [shape: f32[1,32], index: 2, kind: input, shape index: {}]   ;;  %s939_s3 = inlined_call_operand.vmem [shape: f32[2,8,32], index: 3, kind: output, shape index: {}]  }
   0x1   :  { %v653_v0 = vld [vmem:[%s936_s0] sm:$0xff]  ;;  %v658_v1 = vld [vmem:[%s936_s0 + $0x8] sm:$0xff]  ;;  %v673_v4 = vld [vmem:[%s936_s0 + $0x30] sm:$0xff]  ;;  %vm120_vm4 = vcmask 1042432   ;;  %vm140_vm5 = vcmask 1041408   ;;  %vm160_vm6 = vcmask 1040384  }
   0x2   :  { %v663_v2 = vld [vmem:[%s937_s1] sm:$0xff]  ;;  %v668_v3 = vld [vmem:[%s936_s0 + $0x28] sm:$0xff]  ;;  %vm612_vm15 = vcmask 261120  }
   0x3   :  { %v28_v5 = vperm.slane %v663_v2, 0  ;;  %v31_v6 = vperm.slane %v663_v2, 1  ;;  %v51_v7 = vperm.slane %v663_v2, 2  ;;  %v71_v8 = vperm.slane %v663_v2, 3 }
   0x4   :  { %v91_v9 = vperm.slane %v663_v2, 4  ;;  %v111_v10 = vperm.slane %v663_v2, 5  ;;  %v682_v11 = vperm.slane %v663_v2, 6 }
   0x5   :  { %v29_v12 = vmul.f32 %v28_v5, %v653_v0  ;;  %v30_v13 = vmul.f32 %v28_v5, %v668_v3  ;;  %v32_v14 = vmul.f32 %v31_v6, %v653_v0  ;;  %v33_v15 = vmul.f32 %v31_v6, %v658_v1 }
   0x6   :  { %v34_v16 = vmul.f32 %v31_v6, %v668_v3  ;;  %v35_v17 = vmul.f32 %v31_v6, %v673_v4  ;;  %v52_v18 = vmul.f32 %v51_v7, %v653_v0  ;;  %v53_v19 = vmul.f32 %v51_v7, %v658_v1 }
   0x7   :  { %v41_v20 = vrot.slane %v32_v14, 1  ;;  %v42_v21 = vrot.slane %v33_v15, 1  ;;  %v54_v22 = vmul.f32 %v51_v7, %v668_v3  ;;  %v55_v23 = vmul.f32 %v51_v7, %v673_v4 }
   0x8   :  { %v44_v24 = vrot.slane %v34_v16, 1  ;;  %v45_v25 = vrot.slane %v35_v17, 1  ;;  %v61_v26 = vrot.slane %v52_v18, 2  ;;  %v62_v27 = vrot.slane %v53_v19, 2 }
   0x9   :  { %v43_v28 = vsel %vm40_vm0, %v41_v20, %v42_v21  ;;  %v64_v29 = vrot.slane %v54_v22, 2  ;;  %v65_v30 = vrot.slane %v55_v23, 2  ;;  %v72_v31 = vmul.f32 %v71_v8, %v653_v0 }
   0xa   :  { %v46_v32 = vsel %vm40_vm0, %v44_v24, %v45_v25  ;;  %v49_v33 = vadd.f32 %v43_v28, %v29_v12  ;;  %v63_v34 = vsel %vm60_vm1, %v61_v26, %v62_v27  ;;  %v73_v35 = vmul.f32 %v71_v8, %v658_v1 }
   0xb   :  { %v50_v36 = vadd.f32 %v46_v32, %v30_v13  ;;  %v66_v37 = vsel %vm60_vm1, %v64_v29, %v65_v30  ;;  %v74_v38 = vmul.f32 %v71_v8, %v668_v3  ;;  %v75_v39 = vmul.f32 %v71_v8, %v673_v4 }
   0xc   :  { %v69_v40 = vadd.f32 %v63_v34, %v49_v33  ;;  %v81_v41 = vrot.slane %v72_v31, 3  ;;  %v82_v42 = vrot.slane %v73_v35, 3  ;;  %v92_v43 = vmul.f32 %v91_v9, %v653_v0  ;;  %v741_v33 = vld [vmem:[%s936_s0 + $0x10] sm:$0xff] }
   0xd   :  { %v70_v44 = vadd.f32 %v66_v37, %v50_v36  ;;  %v84_v45 = vrot.slane %v74_v38, 3  ;;  %v85_v46 = vrot.slane %v75_v39, 3  ;;  %v93_v47 = vmul.f32 %v91_v9, %v658_v1 }
   0xe   :  { %v83_v48 = vsel %vm80_vm2, %v81_v41, %v82_v42  ;;  %v94_v49 = vmul.f32 %v91_v9, %v668_v3  ;;  %v95_v50 = vmul.f32 %v91_v9, %v673_v4  ;;  %v101_v51 = vrot.slane %v92_v43, 4  ;;  %v719_v9 = vld [vmem:[%s937_s1 + $0x8] sm:$0xff] }
   0xf   :  { %v86_v52 = vsel %vm80_vm2, %v84_v45, %v85_v46  ;;  %v89_v53 = vadd.f32 %v83_v48, %v69_v40  ;;  %v102_v54 = vrot.slane %v93_v47, 4  ;;  %v112_v55 = vmul.f32 %v111_v10, %v653_v0 }
  0x10   :  { %v90_v56 = vadd.f32 %v86_v52, %v70_v44  ;;  %v104_v57 = vrot.slane %v94_v49, 4  ;;  %v105_v58 = vrot.slane %v95_v50, 4  ;;  %v113_v59 = vmul.f32 %v111_v10, %v658_v1 }
  0x11   :  { %v103_v60 = vsel %vm100_vm3, %v101_v51, %v102_v54  ;;  %v114_v61 = vmul.f32 %v111_v10, %v668_v3  ;;  %v115_v62 = vmul.f32 %v111_v10, %v673_v4  ;;  %v121_v63 = vrot.slane %v112_v55, 5 }
  0x12   :  { %v106_v5 = vsel %vm100_vm3, %v104_v57, %v105_v58  ;;  %v109_v6 = vadd.f32 %v103_v60, %v89_v53  ;;  %v122_v7 = vrot.slane %v113_v59, 5  ;;  %v132_v8 = vmul.f32 %v682_v11, %v653_v0 }
  0x13   :  { %v110_v12 = vadd.f32 %v106_v5, %v90_v56  ;;  %v124_v13 = vrot.slane %v114_v61, 5  ;;  %v125_v14 = vrot.slane %v115_v62, 5  ;;  %v133_v15 = vmul.f32 %v682_v11, %v658_v1 }
  0x14   :  { %v123_v10 = vsel %vm120_vm4, %v121_v63, %v122_v7  ;;  %v134_v16 = vmul.f32 %v682_v11, %v668_v3  ;;  %v135_v17 = vmul.f32 %v682_v11, %v673_v4  ;;  %v141_v18 = vrot.slane %v132_v8, 6 }
  0x15   :  { %v126_v19 = vsel %vm120_vm4, %v124_v13, %v125_v14  ;;  %v129_v20 = vadd.f32 %v123_v10, %v109_v6  ;;  %v142_v21 = vrot.slane %v133_v15, 6  ;;  %v151_v22 = vperm.slane %v663_v2, 7 }
  0x16   :  { %v130_v23 = vadd.f32 %v126_v19, %v110_v12  ;;  %v144_v24 = vrot.slane %v134_v16, 6  ;;  %v145_v25 = vrot.slane %v135_v17, 6  ;;  %v171_v26 = vperm.slane %v719_v9, 0 }
  0x17   :  { %v143_v27 = vsel %vm140_vm5, %v141_v18, %v142_v21  ;;  %v152_v28 = vmul.f32 %v151_v22, %v653_v0  ;;  %v153_v29 = vmul.f32 %v151_v22, %v658_v1  ;;  %v154_v11 = vmul.f32 %v151_v22, %v668_v3  ;;  %v746_v3 = vld [vmem:[%s936_s0 + $0x38] sm:$0xff] }
  0x18   :  { %v146_v30 = vsel %vm140_vm5, %v144_v24, %v145_v25  ;;  %v149_v31 = vadd.f32 %v143_v27, %v129_v20  ;;  %v155_v32 = vmul.f32 %v151_v22, %v673_v4  ;;  %v172_v2 = vmul.f32 %v171_v26, %v658_v1 }
  0x19   :  { %v150_v34 = vadd.f32 %v146_v30, %v130_v23  ;;  %v161_v35 = vrot.slane %v152_v28, 7  ;;  %v162_v36 = vrot.slane %v153_v29, 7  ;;  %v164_v0 = vrot.slane %v154_v11, 7 }
  0x1a   :  { %v165_v37 = vrot.slane %v155_v32, 7  ;;  %v173_v38 = vmul.f32 %v171_v26, %v673_v4  ;;  %v176_v39 = vperm.slane %v719_v9, 1  ;;  %v195_v40 = vperm.slane %v719_v9, 2 }
  0x1b   :  { %v163_v41 = vsel %vm160_vm6, %v161_v35, %v162_v36  ;;  %v214_v42 = vperm.slane %v719_v9, 3  ;;  %v233_v43 = vperm.slane %v719_v9, 4  ;;  %v252_v44 = vperm.slane %v719_v9, 5  ;;  %v782_v35 = vld [vmem:[%s937_s1 + $0x10] sm:$0xff] }
  0x1c   :  { %v166_v45 = vsel %vm160_vm6, %v164_v0, %v165_v37  ;;  %v169_v46 = vadd.f32 %v163_v41, %v149_v31  ;;  %v177_v47 = vmul.f32 %v176_v39, %v658_v1  ;;  %v178_v48 = vmul.f32 %v176_v39, %v741_v33 }
  0x1d   :  { %v170_v49 = vadd.f32 %v166_v45, %v150_v34  ;;  %v179_v50 = vmul.f32 %v176_v39, %v673_v4  ;;  %v180_v51 = vmul.f32 %v176_v39, %v746_v3  ;;  %v196_v52 = vmul.f32 %v195_v40, %v658_v1 }
  0x1e   :  { %v174_v53 = vadd.f32 %v172_v2, %v169_v46  ;;  %v185_v54 = vrot.slane %v177_v47, 1  ;;  %v186_v55 = vrot.slane %v178_v48, 1  ;;  %v197_v56 = vmul.f32 %v195_v40, %v741_v33 }
  0x1f   :  { %v175_v57 = vadd.f32 %v173_v38, %v170_v49  ;;  %v188_v58 = vrot.slane %v179_v50, 1  ;;  %v189_v59 = vrot.slane %v180_v51, 1  ;;  %v198_v60 = vmul.f32 %v195_v40, %v673_v4 }
  0x20   :  { %v187_v61 = vsel %vm40_vm0, %v185_v54, %v186_v55  ;;  %v199_v62 = vmul.f32 %v195_v40, %v746_v3  ;;  %v204_v63 = vrot.slane %v196_v52, 2  ;;  %v205_v5 = vrot.slane %v197_v56, 2 }
  0x21   :  { %v190_v6 = vsel %vm40_vm0, %v188_v58, %v189_v59  ;;  %v193_v7 = vadd.f32 %v187_v61, %v174_v53  ;;  %v207_v8 = vrot.slane %v198_v60, 2  ;;  %v215_v12 = vmul.f32 %v214_v42, %v658_v1 }
  0x22   :  { %v194_v13 = vadd.f32 %v190_v6, %v175_v57  ;;  %v206_v14 = vsel %vm60_vm1, %v204_v63, %v205_v5  ;;  %v208_v15 = vrot.slane %v199_v62, 2  ;;  %v216_v10 = vmul.f32 %v214_v42, %v741_v33 }
  0x23   :  { %v212_v16 = vadd.f32 %v206_v14, %v193_v7  ;;  %v217_v17 = vmul.f32 %v214_v42, %v673_v4  ;;  %v218_v18 = vmul.f32 %v214_v42, %v746_v3  ;;  %v223_v19 = vrot.slane %v215_v12, 3 }
  0x24   :  { %v209_v20 = vsel %vm60_vm1, %v207_v8, %v208_v15  ;;  %v224_v21 = vrot.slane %v216_v10, 3  ;;  %v234_v22 = vmul.f32 %v233_v43, %v658_v1  ;;  %v235_v23 = vmul.f32 %v233_v43, %v741_v33 }
  0x25   :  { %v213_v24 = vadd.f32 %v209_v20, %v194_v13  ;;  %v226_v25 = vrot.slane %v217_v17, 3  ;;  %v227_v26 = vrot.slane %v218_v18, 3  ;;  %v236_v27 = vmul.f32 %v233_v43, %v673_v4 }
  0x26   :  { %v225_v28 = vsel %vm80_vm2, %v223_v19, %v224_v21  ;;  %v237_v29 = vmul.f32 %v233_v43, %v746_v3  ;;  %v242_v11 = vrot.slane %v234_v22, 4  ;;  %v243_v30 = vrot.slane %v235_v23, 4 }
  0x27   :  { %v228_v31 = vsel %vm80_vm2, %v226_v25, %v227_v26  ;;  %v231_v32 = vadd.f32 %v225_v28, %v212_v16  ;;  %v245_v2 = vrot.slane %v236_v27, 4  ;;  %v253_v34 = vmul.f32 %v252_v44, %v658_v1 }
  0x28   :  { %v232_v36 = vadd.f32 %v228_v31, %v213_v24  ;;  %v244_v0 = vsel %vm100_vm3, %v242_v11, %v243_v30  ;;  %v246_v37 = vrot.slane %v237_v29, 4  ;;  %v254_v38 = vmul.f32 %v252_v44, %v741_v33 }
  0x29   :  { %v250_v39 = vadd.f32 %v244_v0, %v231_v32  ;;  %v255_v40 = vmul.f32 %v252_v44, %v673_v4  ;;  %v256_v41 = vmul.f32 %v252_v44, %v746_v3  ;;  %v261_v42 = vrot.slane %v253_v34, 5 }
  0x2a   :  { %v247_v43 = vsel %vm100_vm3, %v245_v2, %v246_v37  ;;  %v262_v45 = vrot.slane %v254_v38, 5  ;;  %v271_v46 = vperm.slane %v719_v9, 6  ;;  %v290_v47 = vperm.slane %v719_v9, 7 }
  0x2b   :  { %v251_v48 = vadd.f32 %v247_v43, %v232_v36  ;;  %v264_v49 = vrot.slane %v255_v40, 5  ;;  %v265_v50 = vrot.slane %v256_v41, 5  ;;  %v309_v51 = vperm.slane %v782_v35, 0 }
  0x2c   :  { %v263_v52 = vsel %vm120_vm4, %v261_v42, %v262_v45  ;;  %v272_v53 = vmul.f32 %v271_v46, %v658_v1  ;;  %v273_v54 = vmul.f32 %v271_v46, %v741_v33  ;;  %v274_v44 = vmul.f32 %v271_v46, %v673_v4 }
  0x2d   :  { %v266_v55 = vsel %vm120_vm4, %v264_v49, %v265_v50  ;;  %v269_v56 = vadd.f32 %v263_v52, %v250_v39  ;;  %v275_v57 = vmul.f32 %v271_v46, %v746_v3  ;;  %v291_v9 = vmul.f32 %v290_v47, %v658_v1  ;;  %v808_v1 = vld [vmem:[%s936_s0 + $0x18] sm:$0xff] }
  0x2e   :  { %v270_v58 = vadd.f32 %v266_v55, %v251_v48  ;;  %v280_v59 = vrot.slane %v272_v53, 6  ;;  %v281_v60 = vrot.slane %v273_v54, 6  ;;  %v283_v61 = vrot.slane %v274_v44, 6 }
  0x2f   :  { %v284_v62 = vrot.slane %v275_v57, 6  ;;  %v292_v63 = vmul.f32 %v290_v47, %v741_v33  ;;  %v293_v5 = vmul.f32 %v290_v47, %v673_v4  ;;  %v294_v6 = vmul.f32 %v290_v47, %v746_v3  ;;  %v814_v4 = vld [vmem:[%s936_s0 + $0x40] sm:$0xff] }
  0x30   :  { %v282_v7 = vsel %vm140_vm5, %v280_v59, %v281_v60  ;;  %v299_v8 = vrot.slane %v291_v9, 7  ;;  %v310_v12 = vmul.f32 %v309_v51, %v741_v33  ;;  %v311_v13 = vmul.f32 %v309_v51, %v746_v3 }
  0x31   :  { %v285_v14 = vsel %vm140_vm5, %v283_v61, %v284_v62  ;;  %v288_v15 = vadd.f32 %v282_v7, %v269_v56  ;;  %v300_v10 = vrot.slane %v292_v63, 7  ;;  %v302_v16 = vrot.slane %v293_v5, 7 }
  0x32   :  { %v289_v17 = vadd.f32 %v285_v14, %v270_v58  ;;  %v303_v18 = vrot.slane %v294_v6, 7  ;;  %v314_v19 = vperm.slane %v782_v35, 1  ;;  %v333_v20 = vperm.slane %v782_v35, 2 }
  0x33   :  { %v301_v21 = vsel %vm160_vm6, %v299_v8, %v300_v10  ;;  %v352_v22 = vperm.slane %v782_v35, 3  ;;  %v371_v23 = vperm.slane %v782_v35, 4  ;;  %v390_v24 = vperm.slane %v782_v35, 5 }
  0x34   :  { %v304_v25 = vsel %vm160_vm6, %v302_v16, %v303_v18  ;;  %v307_v26 = vadd.f32 %v301_v21, %v288_v15  ;;  %v315_v27 = vmul.f32 %v314_v19, %v741_v33  ;;  %v316_v28 = vmul.f32 %v314_v19, %v808_v1  ;;  %v849_v15 = vld [vmem:[%s937_s1 + $0x18] sm:$0x7f] }
  0x35   :  { %v308_v29 = vadd.f32 %v304_v25, %v289_v17  ;;  %v317_v11 = vmul.f32 %v314_v19, %v746_v3  ;;  %v318_v30 = vmul.f32 %v314_v19, %v814_v4  ;;  %v334_v31 = vmul.f32 %v333_v20, %v741_v33 }
  0x36   :  { %v312_v32 = vadd.f32 %v310_v12, %v307_v26  ;;  %v323_v2 = vrot.slane %v315_v27, 1  ;;  %v324_v34 = vrot.slane %v316_v28, 1  ;;  %v335_v36 = vmul.f32 %v333_v20, %v808_v1 }
  0x37   :  { %v313_v0 = vadd.f32 %v311_v13, %v308_v29  ;;  %v326_v37 = vrot.slane %v317_v11, 1  ;;  %v327_v38 = vrot.slane %v318_v30, 1  ;;  %v336_v39 = vmul.f32 %v333_v20, %v746_v3 }
  0x38   :  { %v325_v40 = vsel %vm40_vm0, %v323_v2, %v324_v34  ;;  %v337_v41 = vmul.f32 %v333_v20, %v814_v4  ;;  %v342_v42 = vrot.slane %v334_v31, 2  ;;  %v343_v43 = vrot.slane %v335_v36, 2 }
  0x39   :  { %v328_v45 = vsel %vm40_vm0, %v326_v37, %v327_v38  ;;  %v331_v46 = vadd.f32 %v325_v40, %v312_v32  ;;  %v345_v47 = vrot.slane %v336_v39, 2  ;;  %v353_v48 = vmul.f32 %v352_v22, %v741_v33 }
  0x3a   :  { %v332_v49 = vadd.f32 %v328_v45, %v313_v0  ;;  %v344_v50 = vsel %vm60_vm1, %v342_v42, %v343_v43  ;;  %v346_v51 = vrot.slane %v337_v41, 2  ;;  %v354_v52 = vmul.f32 %v352_v22, %v808_v1 }
  0x3b   :  { %v350_v53 = vadd.f32 %v344_v50, %v331_v46  ;;  %v355_v54 = vmul.f32 %v352_v22, %v746_v3  ;;  %v356_v44 = vmul.f32 %v352_v22, %v814_v4  ;;  %v361_v55 = vrot.slane %v353_v48, 3 }
  0x3c   :  { %v347_v56 = vsel %vm60_vm1, %v345_v47, %v346_v51  ;;  %v362_v57 = vrot.slane %v354_v52, 3  ;;  %v372_v9 = vmul.f32 %v371_v23, %v741_v33  ;;  %v373_v58 = vmul.f32 %v371_v23, %v808_v1 }
  0x3d   :  { %v351_v59 = vadd.f32 %v347_v56, %v332_v49  ;;  %v364_v60 = vrot.slane %v355_v54, 3  ;;  %v365_v61 = vrot.slane %v356_v44, 3  ;;  %v374_v62 = vmul.f32 %v371_v23, %v746_v3 }
  0x3e   :  { %v363_v63 = vsel %vm80_vm2, %v361_v55, %v362_v57  ;;  %v375_v5 = vmul.f32 %v371_v23, %v814_v4  ;;  %v380_v6 = vrot.slane %v372_v9, 4  ;;  %v381_v7 = vrot.slane %v373_v58, 4 }
  0x3f   :  { %v366_v8 = vsel %vm80_vm2, %v364_v60, %v365_v61  ;;  %v369_v12 = vadd.f32 %v363_v63, %v350_v53  ;;  %v383_v13 = vrot.slane %v374_v62, 4  ;;  %v391_v14 = vmul.f32 %v390_v24, %v741_v33 }
  0x40   :  { %v370_v10 = vadd.f32 %v366_v8, %v351_v59  ;;  %v382_v16 = vsel %vm100_vm3, %v380_v6, %v381_v7  ;;  %v384_v17 = vrot.slane %v375_v5, 4  ;;  %v392_v18 = vmul.f32 %v390_v24, %v808_v1 }
  0x41   :  { %v388_v19 = vadd.f32 %v382_v16, %v369_v12  ;;  %v393_v20 = vmul.f32 %v390_v24, %v746_v3  ;;  %v394_v21 = vmul.f32 %v390_v24, %v814_v4  ;;  %v399_v22 = vrot.slane %v391_v14, 5 }
  0x42   :  { %v385_v23 = vsel %vm100_vm3, %v383_v13, %v384_v17  ;;  %v400_v25 = vrot.slane %v392_v18, 5  ;;  %v409_v26 = vperm.slane %v782_v35, 6  ;;  %v428_v27 = vperm.slane %v782_v35, 7 }
  0x43   :  { %v389_v28 = vadd.f32 %v385_v23, %v370_v10  ;;  %v402_v29 = vrot.slane %v393_v20, 5  ;;  %v403_v11 = vrot.slane %v394_v21, 5  ;;  %v447_v30 = vperm.slane %v849_v15, 0 }
  0x44   :  { %v401_v31 = vsel %vm120_vm4, %v399_v22, %v400_v25  ;;  %v410_v32 = vmul.f32 %v409_v26, %v741_v33  ;;  %v411_v2 = vmul.f32 %v409_v26, %v808_v1  ;;  %v412_v24 = vmul.f32 %v409_v26, %v746_v3 }
  0x45   :  { %v404_v34 = vsel %vm120_vm4, %v402_v29, %v403_v11  ;;  %v407_v36 = vadd.f32 %v401_v31, %v388_v19  ;;  %v413_v0 = vmul.f32 %v409_v26, %v814_v4  ;;  %v429_v35 = vmul.f32 %v428_v27, %v741_v33  ;;  %v875_v33 = vld [vmem:[%s936_s0 + $0x20] sm:$0x3f] }
  0x46   :  { %v408_v37 = vadd.f32 %v404_v34, %v389_v28  ;;  %v418_v38 = vrot.slane %v410_v32, 6  ;;  %v419_v39 = vrot.slane %v411_v2, 6  ;;  %v421_v40 = vrot.slane %v412_v24, 6 }
  0x47   :  { %v422_v41 = vrot.slane %v413_v0, 6  ;;  %v430_v42 = vmul.f32 %v428_v27, %v808_v1  ;;  %v431_v43 = vmul.f32 %v428_v27, %v746_v3  ;;  %v432_v45 = vmul.f32 %v428_v27, %v814_v4  ;;  %v881_v3 = vld [vmem:[%s936_s0 + $0x48] sm:$0x3f] }
  0x48   :  { %v420_v46 = vsel %vm140_vm5, %v418_v38, %v419_v39  ;;  %v437_v47 = vrot.slane %v429_v35, 7  ;;  %v448_v48 = vmul.f32 %v447_v30, %v808_v1  ;;  %v449_v49 = vmul.f32 %v447_v30, %v814_v4 }
  0x49   :  { %v423_v50 = vsel %vm140_vm5, %v421_v40, %v422_v41  ;;  %v426_v51 = vadd.f32 %v420_v46, %v407_v36  ;;  %v438_v52 = vrot.slane %v430_v42, 7  ;;  %v440_v53 = vrot.slane %v431_v43, 7 }
  0x4a   :  { %v427_v54 = vadd.f32 %v423_v50, %v408_v37  ;;  %v441_v44 = vrot.slane %v432_v45, 7  ;;  %v452_v55 = vperm.slane %v849_v15, 1  ;;  %v471_v56 = vperm.slane %v849_v15, 2 }
  0x4b   :  { %v439_v57 = vsel %vm160_vm6, %v437_v47, %v438_v52  ;;  %v490_v9 = vperm.slane %v849_v15, 3  ;;  %v509_v58 = vperm.slane %v849_v15, 4  ;;  %v528_v59 = vperm.slane %v849_v15, 5 }
  0x4c   :  { %v442_v60 = vsel %vm160_vm6, %v440_v53, %v441_v44  ;;  %v445_v61 = vadd.f32 %v439_v57, %v426_v51  ;;  %v453_v62 = vmul.f32 %v452_v55, %v808_v1  ;;  %v454_v63 = vmul.f32 %v452_v55, %v875_v33 }
  0x4d   :  { %v446_v5 = vadd.f32 %v442_v60, %v427_v54  ;;  %v455_v6 = vmul.f32 %v452_v55, %v814_v4  ;;  %v456_v7 = vmul.f32 %v452_v55, %v881_v3  ;;  %v472_v8 = vmul.f32 %v471_v56, %v808_v1 }
  0x4e   :  { %v450_v12 = vadd.f32 %v448_v48, %v445_v61  ;;  %v461_v13 = vrot.slane %v453_v62, 1  ;;  %v462_v14 = vrot.slane %v454_v63, 1  ;;  %v473_v10 = vmul.f32 %v471_v56, %v875_v33 }
  0x4f   :  { %v451_v16 = vadd.f32 %v449_v49, %v446_v5  ;;  %v464_v17 = vrot.slane %v455_v6, 1  ;;  %v465_v18 = vrot.slane %v456_v7, 1  ;;  %v474_v19 = vmul.f32 %v471_v56, %v814_v4 }
  0x50   :  { %v463_v20 = vsel %vm40_vm0, %v461_v13, %v462_v14  ;;  %v475_v21 = vmul.f32 %v471_v56, %v881_v3  ;;  %v480_v22 = vrot.slane %v472_v8, 2  ;;  %v481_v23 = vrot.slane %v473_v10, 2 }
  0x51   :  { %v466_v25 = vsel %vm40_vm0, %v464_v17, %v465_v18  ;;  %v469_v26 = vadd.f32 %v463_v20, %v450_v12  ;;  %v483_v27 = vrot.slane %v474_v19, 2  ;;  %v491_v28 = vmul.f32 %v490_v9, %v808_v1  ;;  %v621_v18 = vld [vmem:[%s938_s2] ss:$0 sm:$0xff] }
  0x52   :  { %v470_v29 = vadd.f32 %v466_v25, %v451_v16  ;;  %v482_v11 = vsel %vm60_vm1, %v480_v22, %v481_v23  ;;  %v484_v30 = vrot.slane %v475_v21, 2  ;;  %v492_v31 = vmul.f32 %v490_v9, %v875_v33 }
  0x53   :  { %v488_v32 = vadd.f32 %v482_v11, %v469_v26  ;;  %v493_v2 = vmul.f32 %v490_v9, %v814_v4  ;;  %v494_v24 = vmul.f32 %v490_v9, %v881_v3  ;;  %v499_v34 = vrot.slane %v491_v28, 3 }
  0x54   :  { %v485_v36 = vsel %vm60_vm1, %v483_v27, %v484_v30  ;;  %v500_v0 = vrot.slane %v492_v31, 3  ;;  %v510_v35 = vmul.f32 %v509_v58, %v808_v1  ;;  %v511_v37 = vmul.f32 %v509_v58, %v875_v33 }
  0x55   :  { %v489_v38 = vadd.f32 %v485_v36, %v470_v29  ;;  %v502_v39 = vrot.slane %v493_v2, 3  ;;  %v503_v40 = vrot.slane %v494_v24, 3  ;;  %v512_v41 = vmul.f32 %v509_v58, %v814_v4 }
  0x56   :  { %v501_v42 = vsel %vm80_vm2, %v499_v34, %v500_v0  ;;  %v513_v43 = vmul.f32 %v509_v58, %v881_v3  ;;  %v518_v45 = vrot.slane %v510_v35, 4  ;;  %v519_v46 = vrot.slane %v511_v37, 4 }
  0x57   :  { %v504_v47 = vsel %vm80_vm2, %v502_v39, %v503_v40  ;;  %v507_v48 = vadd.f32 %v501_v42, %v488_v32  ;;  %v521_v49 = vrot.slane %v512_v41, 4  ;;  %v529_v50 = vmul.f32 %v528_v59, %v808_v1 }
  0x58   :  { %v508_v51 = vadd.f32 %v504_v47, %v489_v38  ;;  %v520_v52 = vsel %vm100_vm3, %v518_v45, %v519_v46  ;;  %v522_v53 = vrot.slane %v513_v43, 4  ;;  %v530_v54 = vmul.f32 %v528_v59, %v875_v33 }
  0x59   :  { %v526_v44 = vadd.f32 %v520_v52, %v507_v48  ;;  %v531_v55 = vmul.f32 %v528_v59, %v814_v4  ;;  %v532_v56 = vmul.f32 %v528_v59, %v881_v3  ;;  %v537_v57 = vrot.slane %v529_v50, 5 }
  0x5a   :  { %v523_v9 = vsel %vm100_vm3, %v521_v49, %v522_v53  ;;  %v538_v58 = vrot.slane %v530_v54, 5  ;;  %v547_v60 = vperm.slane %v849_v15, 6 }
  0x5b   :  { %v527_v61 = vadd.f32 %v523_v9, %v508_v51  ;;  %v540_v62 = vrot.slane %v531_v55, 5  ;;  %v541_v63 = vrot.slane %v532_v56, 5 }
  0x5c   :  { %v539_v5 = vsel %vm120_vm4, %v537_v57, %v538_v58  ;;  %v548_v6 = vmul.f32 %v547_v60, %v808_v1  ;;  %v549_v7 = vmul.f32 %v547_v60, %v875_v33  ;;  %v550_v8 = vmul.f32 %v547_v60, %v814_v4 }
  0x5d   :  { %v542_v12 = vsel %vm120_vm4, %v540_v62, %v541_v63  ;;  %v545_v59 = vadd.f32 %v539_v5, %v526_v44  ;;  %v551_v13 = vmul.f32 %v547_v60, %v881_v3 }
  0x5e   :  { %v546_v14 = vadd.f32 %v542_v12, %v527_v61  ;;  %v556_v10 = vrot.slane %v548_v6, 6  ;;  %v557_v16 = vrot.slane %v549_v7, 6  ;;  %v559_v15 = vrot.slane %v550_v8, 6 }
  0x5f   :  { %v560_v17 = vrot.slane %v551_v13, 6 }
  0x60   :  { %v558_v1 = vsel %vm140_vm5, %v556_v10, %v557_v16 }
  0x61   :  { %v561_v33 = vsel %vm140_vm5, %v559_v15, %v560_v17  ;;  %v564_v19 = vadd.f32 %v558_v1, %v545_v59 }
  0x62   :  { %v565_v4 = vadd.f32 %v561_v33, %v546_v14 }
  0x63   :  { %v570_v20 = vadd.f32 %v621_v18, %v564_v19 }
  0x64   :  { %v571_v21 = vadd.f32 %v621_v18, %v565_v4 }
  0x65   :  { %v619_v22 = vmul.f32 -1.442695, %v570_v20 }
  0x66   :  { %v620_v23 = vmul.f32 -1.442695, %v571_v21 }
  0x67   :  { %622 = vpow2.f32 %v619_v22 }
  0x68   :  { %624 = vpow2.f32 %v620_v23 }
  0x6d   :  { %v623_v3 = vpop.eup %622 }
  0x6e   :  { %v625_v25 = vpop.eup %624  ;;  %v578_v26 = vadd.f32 1.0, %v623_v3 }
  0x6f   :  { %v579_v27 = vadd.f32 1.0, %v625_v25 }
  0x70   :  { %626 = vrcp.f32 %v578_v26  ;;  %vm585_vm7 = vweird.f32 %v578_v26  ;;  %v591_v30 = vand.u32 2147483648, %v578_v26  ;;  %v589_v2 = vand.u32 2147483647, %v578_v26 }
  0x71   :  { %628 = vrcp.f32 %v579_v27  ;;  %v606_v24 = vand.u32 2147483648, %v579_v27  ;;  %vm600_vm9 = vweird.f32 %v579_v27  ;;  %v604_v36 = vand.u32 2147483647, %v579_v27 }
  0x72   :  { %v592_v35 = vor.u32 1.1754944e-38, %v591_v30  ;;  %vm590_vm12 = vcmp.eq.f32.partialorder %v589_v2, 8.507059e+37 }
  0x73   :  { %v607_v39 = vor.u32 1.1754944e-38, %v606_v24  ;;  %vm605_vm14 = vcmp.eq.f32.partialorder %v604_v36, 8.507059e+37 }
  0x76   :  { %v627_v28 = vpop.eup %626 }
  0x77   :  { %v629_v29 = vpop.eup %628  ;;  %v581_v11 = vmul.f32 %v627_v28, %v578_v26  ;;  %vm586_vm8 = vweird.f32 %v627_v28 }
  0x78   :  { %v596_v31 = vmul.f32 %v629_v29, %v579_v27  ;;  %vm601_vm10 = vweird.f32 %v629_v29  ;;  %vm587_vm11 = vmor %vm585_vm7, %vm586_vm8 }
  0x79   :  { %v582_v32 = vsub.f32 1.0, %v581_v11  ;;  %vm602_vm13 = vmor %vm600_vm9, %vm601_vm10 }
  0x7a   :  { %v597_v34 = vsub.f32 1.0, %v596_v31 }
  0x7b   :  { %v583_v0 = vmul.f32 %v627_v28, %v582_v32 }
  0x7c   :  { %v598_v37 = vmul.f32 %v629_v29, %v597_v34 }
  0x7d   :  { %v584_v38 = vadd.f32 %v627_v28, %v583_v0 }
  0x7e   :  { %v599_v40 = vadd.f32 %v629_v29, %v598_v37 }
  0x7f   :  { %v588_v41 = vsel %vm587_vm11, %v627_v28, %v584_v38 }
  0x80   :  { %v593_v42 = vsel %vm590_vm12, %v592_v35, %v588_v41  ;;  %v603_v43 = vsel %vm602_vm13, %v629_v29, %v599_v40 }
  0x81   :  { %v608_v45 = vsel %vm605_vm14, %v607_v39, %v603_v43  ;;  %v610_v46 = vmul.f32 %v593_v42, %v570_v20 }
  0x82   :  { %v611_v47 = vmul.f32 %v608_v45, %v571_v21 }
  0x83   :  { %613 = vst.msk [vmem:[%s939_s3] sm:$0xff] %vm612_vm15, %v610_v46 }
  0x84   :  { %614 = vst.msk [vmem:[%s939_s3 + $0x8] sm:$0xff] %vm612_vm15, %v611_v47 }

</bundles_post_ra>
